<compile_context>
chip_gen: v7x
topology: tpu7x:2x2x1
jax: 0.10.0
libtpu: 0.0.40
codegen_flags: <defaults>
</compile_context>

<pallas_src>
import functools
import math

import jax
import jax.numpy as jnp
from jax.experimental import pallas as pl
from jax.experimental.pallas import tpu as pltpu

GROUPS = 32
EPS = 1e-5


def final_layer_kernel(x_ref, s_ref, st_ref, a_ref, at2_ref, beta_ref,
                       w3_ref, bias_ref, m1_ref, p1_ref, o_ref, *,
                       L, Bt, n_per_group, conv_dtype):
    """One super-block (Bt batch elements packed along lanes) per grid step.

    x_ref    : (Bt, C, L)   input block in natural layout
    s_ref    : (LP, Bt)     segment selector, S[lane, bt] = 1 if lane // L == bt
    st_ref   : (Bt, LP)     its transpose (broadcast segment stats to lanes)
    a_ref    : (G, C)       group membership  (A[g, c] = 1 if channel c in group g)
    at2_ref  : (2C, 2G)     blockdiag(A^T, gamma[:,None]*A^T)  -> [mean ; gamma*rstd]
    beta_ref : (C, 1)       GroupNorm shift
    w3_ref   : (O, 3C)      conv weight, taps concatenated along channels [k=0|k=1|k=2]
    bias_ref : (O, 1)       conv bias
    m1_ref   : (1, LP)      mask for the l-1 tap (0 at segment starts)
    p1_ref   : (1, LP)      mask for the l+1 tap (0 at segment ends)
    o_ref    : (Bt, O, L)   output block in natural layout
    """
    C = a_ref.shape[1]
    LP = Bt * L

    # ---- on-chip relayout: (Bt, C, L) -> lane-dense (C, Bt*L), lane = bt*L + l ----
    if Bt == 1:
        x = x_ref[0].astype(jnp.float32)
    else:
        x = jnp.concatenate(
            [x_ref[bt].astype(jnp.float32) for bt in range(Bt)], axis=-1)    # (C, LP)

    # ---- GroupNorm(32, C): statistics per (group, batch-segment) via MXU ----
    S = s_ref[...]                                                           # (LP, Bt)
    cb_sum = jnp.dot(x, S, preferred_element_type=jnp.float32)               # (C, Bt)
    cb_sq = jnp.dot(x * x, S, preferred_element_type=jnp.float32)            # (C, Bt)
    cb = jnp.concatenate([cb_sum, cb_sq], axis=1)                            # (C, 2Bt)
    gstats = jnp.dot(a_ref[...], cb, preferred_element_type=jnp.float32)     # (G, 2Bt)

    inv_n = 1.0 / n_per_group
    mean = gstats[:, :Bt] * inv_n                                            # (G, Bt)
    var = jnp.maximum(gstats[:, Bt:] * inv_n - mean * mean, 0.0)
    rstd = jax.lax.rsqrt(var + EPS)                                          # (G, Bt)

    # group -> channel (gamma folded into the rstd half), then segment -> lane
    mr = jnp.concatenate([mean, rstd], axis=0)                               # (2G, Bt)
    cstats = jnp.dot(at2_ref[...], mr, preferred_element_type=jnp.float32)   # (2C, Bt)
    lane_stats = jnp.dot(cstats, st_ref[...],
                         preferred_element_type=jnp.float32)                 # (2C, LP)
    mean_l = lane_stats[:C]                                                  # (C, LP)
    scale_l = lane_stats[C:]                                                 # gamma*rstd

    h = (x - mean_l) * scale_l + beta_ref[...]                               # (C, LP)

    # ---- SiLU ----
    h = h * jax.nn.sigmoid(h)

    # ---- Conv1d(C -> O, kernel=3, padding=1): one fused MXU matmul ----
    hc = h.astype(conv_dtype)
    h_m1 = pltpu.roll(hc, shift=1, axis=1) * m1_ref[...]        # h[:, l-1], 0 at l==0
    h_p1 = pltpu.roll(hc, shift=LP - 1, axis=1) * p1_ref[...]   # h[:, l+1], 0 at l==L-1
    h_stack = jnp.concatenate([h_m1, hc, h_p1], axis=0)                      # (3C, LP)
    out = jnp.dot(w3_ref[...], h_stack,
                  preferred_element_type=jnp.float32)                        # (O, LP)
    out = out + bias_ref[...]

    # ---- write back in natural (Bt, O, L) layout (no wrapper transpose needed) ----
    if Bt == 1:
        o_ref[0] = out.astype(o_ref.dtype)
    else:
        for bt in range(Bt):
            o_ref[bt] = out[:, bt * L:(bt + 1) * L].astype(o_ref.dtype)


def _vmem_estimate(Bt, C, O, L, LP, conv_bytes):
    pad8 = lambda n: -(-n // 8) * 8
    pad128 = lambda n: -(-n // 128) * 128
    blk_x = 2 * Bt * pad8(C) * pad128(L) * 4          # input block, double buffered
    blk_o = 2 * Bt * pad8(O) * pad128(L) * 4          # output block, double buffered
    consts = 2 * (2 * LP * Bt * 4 + GROUPS * C * 4 + 4 * C * GROUPS * 4 + C * 4
                  + O * 3 * C * conv_bytes + O * 4 + 2 * pad128(LP) * conv_bytes)
    temps = (10 * pad8(C) * pad128(LP) * 4
             + 3 * pad8(C) * pad128(LP) * conv_bytes
             + 2 * pad8(O) * pad128(LP) * 4)
    return blk_x + blk_o + consts + temps


def final_layer(x, gamma, beta, w, b, *, target_lanes=512, conv_dtype=jnp.bfloat16):
    """x: (B, C, L); w: (O, C, 3); returns (B, O, L) f32."""
    B, C, L = x.shape
    O = w.shape[0]
    G = GROUPS
    assert C % G == 0, "GroupNorm(32, C) requires C % 32 == 0"
    Cg = C // G

    # ---- choose lane packing: Bt batch elements per block, LP = Bt*L lanes ----
    if L >= target_lanes:
        Bt = 1
        # TODO(synk): for very large C*L on v7x (64 MiB VMEM), add an L-tile grid
        # axis with a 1-element halo for the k=3 conv instead of one whole-L block.
    else:
        m = 128 // math.gcd(L, 128)               # Bt granularity keeping LP % 128 == 0
        if m > 4 * max(1, target_lanes // L):     # awkward L: give up on the multiple
            m = 1
        Bt = max(m, (target_lanes // L) // m * m)           # ~target_lanes worth of lanes
        Bt = min(Bt, max(m, ((B + m - 1) // m) * m))        # don't over-pad small batches
    LP = Bt * L
    Bp = ((B + Bt - 1) // Bt) * Bt
    nb = Bp // Bt
    if Bp != B:
        x = jnp.concatenate([x, jnp.zeros((Bp - B, C, L), x.dtype)], axis=0)

    f32 = jnp.float32
    cdt = conv_dtype
    cbytes = jnp.dtype(cdt).itemsize

    # group membership matrices
    A = jnp.repeat(jnp.eye(G, dtype=f32), Cg, axis=1)                    # (G, C)
    At = A.T                                                             # (C, G)
    Zc = jnp.zeros((C, G), f32)
    # blockdiag(A^T, gamma*A^T): rows [0:C] broadcast mean, rows [C:2C] broadcast gamma*rstd
    At2g = jnp.concatenate(
        [jnp.concatenate([At, Zc], axis=1),
         jnp.concatenate([Zc, At * gamma.astype(f32)[:, None]], axis=1)],
        axis=0)                                                          # (2C, 2G)

    # batch-segment selector matrices
    seg = jnp.repeat(jnp.arange(Bt, dtype=jnp.int32), L)                 # (LP,)
    S = (seg[:, None] == jnp.arange(Bt, dtype=jnp.int32)[None, :]).astype(f32)  # (LP, Bt)
    St = S.T                                                             # (Bt, LP)

    # conv weight with the 3 taps concatenated along the input-channel axis
    w3 = jnp.concatenate([w[:, :, 0], w[:, :, 1], w[:, :, 2]], axis=1).astype(cdt)  # (O, 3C)
    beta2 = beta.reshape(C, 1).astype(f32)
    b2 = b.reshape(O, 1).astype(f32)

    # conv boundary masks (position within a length-L segment)
    pos = jnp.arange(LP, dtype=jnp.int32) % L
    m1 = (pos >= 1).astype(cdt).reshape(1, LP)
    p1 = (pos <= L - 2).astype(cdt).reshape(1, LP)

    kernel = functools.partial(final_layer_kernel, L=L, Bt=Bt,
                               n_per_group=float(Cg * L), conv_dtype=cdt)

    vmem_limit = int(min(max(2 * _vmem_estimate(Bt, C, O, L, LP, cbytes),
                             32 * 2**20), 100 * 2**20))

    out = pl.pallas_call(
        kernel,
        out_shape=jax.ShapeDtypeStruct((Bp, O, L), jnp.float32),
        grid=(nb,),
        in_specs=[
            pl.BlockSpec((Bt, C, L), lambda i: (i, 0, 0)),       # x block (natural layout)
            pl.BlockSpec((LP, Bt), lambda i: (0, 0)),            # S
            pl.BlockSpec((Bt, LP), lambda i: (0, 0)),            # S^T
            pl.BlockSpec((G, C), lambda i: (0, 0)),              # A
            pl.BlockSpec((2 * C, 2 * G), lambda i: (0, 0)),      # blockdiag(A^T, gamma*A^T)
            pl.BlockSpec((C, 1), lambda i: (0, 0)),              # beta
            pl.BlockSpec((O, 3 * C), lambda i: (0, 0)),          # conv weight (fused taps)
            pl.BlockSpec((O, 1), lambda i: (0, 0)),              # conv bias
            pl.BlockSpec((1, LP), lambda i: (0, 0)),             # l-1 tap mask
            pl.BlockSpec((1, LP), lambda i: (0, 0)),             # l+1 tap mask
        ],
        out_specs=pl.BlockSpec((Bt, O, L), lambda i: (i, 0, 0)),
        compiler_params=pltpu.CompilerParams(
            dimension_semantics=("parallel",),
            vmem_limit_bytes=vmem_limit),
    )(x, S, St, A, At2g, beta2, w3, b2, m1, p1)

    return out[:B]


def reference(x, gamma, beta, w, b):
    """Pure-JAX reference matching PyTorch semantics."""
    B, C, L = x.shape
    xg = x.reshape(B, GROUPS, -1)
    mean = xg.mean(-1, keepdims=True)
    var = xg.var(-1, keepdims=True)
    xn = ((xg - mean) / jnp.sqrt(var + EPS)).reshape(B, C, L)
    h = xn * gamma[None, :, None] + beta[None, :, None]
    h = h * jax.nn.sigmoid(h)
    out = jax.lax.conv_general_dilated(
        h, w, window_strides=(1,), padding=[(1, 1)],
        dimension_numbers=("NCH", "OIH", "NCH"))
    return out + b[None, :, None]


if __name__ == "__main__":
    # C_in must be divisible by 32 (GroupNorm groups). B=16, L=16 -> Bt=16, LP=256.
    B, C_in, C_out, L = 16, 64, 32, 16

    key = jax.random.PRNGKey(0)
    kx, kw, kb, kg, kbe = jax.random.split(key, 5)

    x = jax.random.normal(kx, (B, C_in, L), dtype=jnp.float32)
    w = 0.05 * jax.random.normal(kw, (C_out, C_in, 3), dtype=jnp.float32)
    b = 0.1 * jax.random.normal(kb, (C_out,), dtype=jnp.float32)
    gamma = 1.0 + 0.1 * jax.random.normal(kg, (C_in,), dtype=jnp.float32)
    beta = 0.1 * jax.random.normal(kbe, (C_in,), dtype=jnp.float32)

    ref = reference(x, gamma, beta, w, b)

    # exact-math path (f32 conv operands)
    out_f32 = jax.block_until_ready(
        final_layer(x, gamma, beta, w, b, conv_dtype=jnp.float32))
    assert out_f32.shape == (B, C_out, L), out_f32.shape
    err = float(jnp.max(jnp.abs(out_f32 - ref)))
    assert err < 2e-4, f"f32 path max abs err {err}"

    # default path (bf16 conv operands, f32 MXU accumulation)
    out_bf = jax.block_until_ready(final_layer(x, gamma, beta, w, b))
    assert out_bf.shape == (B, C_out, L), out_bf.shape
    err_bf = float(jnp.max(jnp.abs(out_bf - ref)))
    assert err_bf < 5e-2, f"bf16 path max abs err {err_bf}"

    # batch not divisible by the packing factor -> exercises the padding path
    out2 = jax.block_until_ready(
        final_layer(x[:5], gamma, beta, w, b, conv_dtype=jnp.float32))
    ref2 = reference(x[:5], gamma, beta, w, b)
    assert out2.shape == (5, C_out, L), out2.shape
    err2 = float(jnp.max(jnp.abs(out2 - ref2)))
    assert err2 < 2e-4, f"padded-batch max abs err {err2}"

    print("KERNEL_OK")
</pallas_src>

<mosaic_0001>
module attributes {stable_mosaic.version = 11 : i64} {
  func.func @final_layer_kernel(%arg0: i32, %arg1: memref<16x64x16xf32, #tpu.memory_space<vmem>>, %arg2: memref<256x16xf32, #tpu.memory_space<vmem>>, %arg3: memref<16x256xf32, #tpu.memory_space<vmem>>, %arg4: memref<32x64xf32, #tpu.memory_space<vmem>>, %arg5: memref<128x64xf32, #tpu.memory_space<vmem>>, %arg6: memref<64x1xf32, #tpu.memory_space<vmem>>, %arg7: memref<32x192xf32, #tpu.memory_space<vmem>>, %arg8: memref<32x1xf32, #tpu.memory_space<vmem>>, %arg9: memref<1x256xf32, #tpu.memory_space<vmem>>, %arg10: memref<1x256xf32, #tpu.memory_space<vmem>>, %arg11: memref<16x32x16xf32, #tpu.memory_space<vmem>>) attributes {dimension_semantics = [#tpu.dimension_semantics<parallel>], iteration_bounds = array<i64: 1>, scalar_prefetch = 0 : i64, scratch_operands = 0 : i64, tpu.core_type = #tpu.core_type<tc>, window_params = [{transform_indices = @transform_0, window_bounds = array<i64: 16, 64, 16>}, {pipeline_mode = #tpu.pipeline_mode<synchronous>, transform_indices = @transform_1, window_bounds = array<i64: 256, 16>}, {pipeline_mode = #tpu.pipeline_mode<synchronous>, transform_indices = @transform_2, window_bounds = array<i64: 16, 256>}, {pipeline_mode = #tpu.pipeline_mode<synchronous>, transform_indices = @transform_3, window_bounds = array<i64: 32, 64>}, {pipeline_mode = #tpu.pipeline_mode<synchronous>, transform_indices = @transform_4, window_bounds = array<i64: 128, 64>}, {pipeline_mode = #tpu.pipeline_mode<synchronous>, transform_indices = @transform_5, window_bounds = array<i64: 64, 1>}, {pipeline_mode = #tpu.pipeline_mode<synchronous>, transform_indices = @transform_6, window_bounds = array<i64: 32, 192>}, {pipeline_mode = #tpu.pipeline_mode<synchronous>, transform_indices = @transform_7, window_bounds = array<i64: 32, 1>}, {pipeline_mode = #tpu.pipeline_mode<synchronous>, transform_indices = @transform_8, window_bounds = array<i64: 1, 256>}, {pipeline_mode = #tpu.pipeline_mode<synchronous>, transform_indices = @transform_9, window_bounds = array<i64: 1, 256>}, {transform_indices = @transform_10, window_bounds = array<i64: 16, 32, 16>}]} {
    %c0 = arith.constant 0 : index
    %c0_0 = arith.constant 0 : index
    %c0_1 = arith.constant 0 : index
    %0 = vector.load %arg1[%c0, %c0_0, %c0_1] : memref<16x64x16xf32, #tpu.memory_space<vmem>>, vector<1x64x16xf32>
    %1 = vector.shape_cast %0 : vector<1x64x16xf32> to vector<64x16xf32>
    %c1 = arith.constant 1 : index
    %c0_2 = arith.constant 0 : index
    %c0_3 = arith.constant 0 : index
    %2 = vector.load %arg1[%c1, %c0_2, %c0_3] : memref<16x64x16xf32, #tpu.memory_space<vmem>>, vector<1x64x16xf32>
    %3 = vector.shape_cast %2 : vector<1x64x16xf32> to vector<64x16xf32>
    %c2 = arith.constant 2 : index
    %c0_4 = arith.constant 0 : index
    %c0_5 = arith.constant 0 : index
    %4 = vector.load %arg1[%c2, %c0_4, %c0_5] : memref<16x64x16xf32, #tpu.memory_space<vmem>>, vector<1x64x16xf32>
    %5 = vector.shape_cast %4 : vector<1x64x16xf32> to vector<64x16xf32>
    %c3 = arith.constant 3 : index
    %c0_6 = arith.constant 0 : index
    %c0_7 = arith.constant 0 : index
    %6 = vector.load %arg1[%c3, %c0_6, %c0_7] : memref<16x64x16xf32, #tpu.memory_space<vmem>>, vector<1x64x16xf32>
    %7 = vector.shape_cast %6 : vector<1x64x16xf32> to vector<64x16xf32>
    %c4 = arith.constant 4 : index
    %c0_8 = arith.constant 0 : index
    %c0_9 = arith.constant 0 : index
    %8 = vector.load %arg1[%c4, %c0_8, %c0_9] : memref<16x64x16xf32, #tpu.memory_space<vmem>>, vector<1x64x16xf32>
    %9 = vector.shape_cast %8 : vector<1x64x16xf32> to vector<64x16xf32>
    %c5 = arith.constant 5 : index
    %c0_10 = arith.constant 0 : index
    %c0_11 = arith.constant 0 : index
    %10 = vector.load %arg1[%c5, %c0_10, %c0_11] : memref<16x64x16xf32, #tpu.memory_space<vmem>>, vector<1x64x16xf32>
    %11 = vector.shape_cast %10 : vector<1x64x16xf32> to vector<64x16xf32>
    %c6 = arith.constant 6 : index
    %c0_12 = arith.constant 0 : index
    %c0_13 = arith.constant 0 : index
    %12 = vector.load %arg1[%c6, %c0_12, %c0_13] : memref<16x64x16xf32, #tpu.memory_space<vmem>>, vector<1x64x16xf32>
    %13 = vector.shape_cast %12 : vector<1x64x16xf32> to vector<64x16xf32>
    %c7 = arith.constant 7 : index
    %c0_14 = arith.constant 0 : index
    %c0_15 = arith.constant 0 : index
    %14 = vector.load %arg1[%c7, %c0_14, %c0_15] : memref<16x64x16xf32, #tpu.memory_space<vmem>>, vector<1x64x16xf32>
    %15 = vector.shape_cast %14 : vector<1x64x16xf32> to vector<64x16xf32>
    %c8 = arith.constant 8 : index
    %c0_16 = arith.constant 0 : index
    %c0_17 = arith.constant 0 : index
    %16 = vector.load %arg1[%c8, %c0_16, %c0_17] : memref<16x64x16xf32, #tpu.memory_space<vmem>>, vector<1x64x16xf32>
    %17 = vector.shape_cast %16 : vector<1x64x16xf32> to vector<64x16xf32>
    %c9 = arith.constant 9 : index
    %c0_18 = arith.constant 0 : index
    %c0_19 = arith.constant 0 : index
    %18 = vector.load %arg1[%c9, %c0_18, %c0_19] : memref<16x64x16xf32, #tpu.memory_space<vmem>>, vector<1x64x16xf32>
    %19 = vector.shape_cast %18 : vector<1x64x16xf32> to vector<64x16xf32>
    %c10 = arith.constant 10 : index
    %c0_20 = arith.constant 0 : index
    %c0_21 = arith.constant 0 : index
    %20 = vector.load %arg1[%c10, %c0_20, %c0_21] : memref<16x64x16xf32, #tpu.memory_space<vmem>>, vector<1x64x16xf32>
    %21 = vector.shape_cast %20 : vector<1x64x16xf32> to vector<64x16xf32>
    %c11 = arith.constant 11 : index
    %c0_22 = arith.constant 0 : index
    %c0_23 = arith.constant 0 : index
    %22 = vector.load %arg1[%c11, %c0_22, %c0_23] : memref<16x64x16xf32, #tpu.memory_space<vmem>>, vector<1x64x16xf32>
    %23 = vector.shape_cast %22 : vector<1x64x16xf32> to vector<64x16xf32>
    %c12 = arith.constant 12 : index
    %c0_24 = arith.constant 0 : index
    %c0_25 = arith.constant 0 : index
    %24 = vector.load %arg1[%c12, %c0_24, %c0_25] : memref<16x64x16xf32, #tpu.memory_space<vmem>>, vector<1x64x16xf32>
    %25 = vector.shape_cast %24 : vector<1x64x16xf32> to vector<64x16xf32>
    %c13 = arith.constant 13 : index
    %c0_26 = arith.constant 0 : index
    %c0_27 = arith.constant 0 : index
    %26 = vector.load %arg1[%c13, %c0_26, %c0_27] : memref<16x64x16xf32, #tpu.memory_space<vmem>>, vector<1x64x16xf32>
    %27 = vector.shape_cast %26 : vector<1x64x16xf32> to vector<64x16xf32>
    %c14 = arith.constant 14 : index
    %c0_28 = arith.constant 0 : index
    %c0_29 = arith.constant 0 : index
    %28 = vector.load %arg1[%c14, %c0_28, %c0_29] : memref<16x64x16xf32, #tpu.memory_space<vmem>>, vector<1x64x16xf32>
    %29 = vector.shape_cast %28 : vector<1x64x16xf32> to vector<64x16xf32>
    %c15 = arith.constant 15 : index
    %c0_30 = arith.constant 0 : index
    %c0_31 = arith.constant 0 : index
    %30 = vector.load %arg1[%c15, %c0_30, %c0_31] : memref<16x64x16xf32, #tpu.memory_space<vmem>>, vector<1x64x16xf32>
    %31 = vector.shape_cast %30 : vector<1x64x16xf32> to vector<64x16xf32>
    %32 = tpu.concatenate %1, %3, %5, %7, %9, %11, %13, %15, %17, %19, %21, %23, %25, %27, %29, %31 in 1 : vector<64x16xf32>, vector<64x16xf32>, vector<64x16xf32>, vector<64x16xf32>, vector<64x16xf32>, vector<64x16xf32>, vector<64x16xf32>, vector<64x16xf32>, vector<64x16xf32>, vector<64x16xf32>, vector<64x16xf32>, vector<64x16xf32>, vector<64x16xf32>, vector<64x16xf32>, vector<64x16xf32>, vector<64x16xf32> -> vector<64x256xf32>
    %c0_32 = arith.constant 0 : index
    %c0_33 = arith.constant 0 : index
    %33 = vector.load %arg2[%c0_32, %c0_33] : memref<256x16xf32, #tpu.memory_space<vmem>>, vector<256x16xf32>
    %cst = arith.constant dense<0.000000e+00> : vector<64x16xf32>
    %34 = tpu.matmul %32, %33, %cst {dimension_numbers = #tpu.dot_dimension_numbers<[1], [0], [0], [1], [0, 0, 1, 1], [], []>} : vector<64x256xf32>, vector<256x16xf32>, vector<64x16xf32> -> vector<64x16xf32>
    %35 = arith.mulf %32, %32 : vector<64x256xf32>
    %cst_34 = arith.constant dense<0.000000e+00> : vector<64x16xf32>
    %36 = tpu.matmul %35, %33, %cst_34 {dimension_numbers = #tpu.dot_dimension_numbers<[1], [0], [0], [1], [0, 0, 1, 1], [], []>} : vector<64x256xf32>, vector<256x16xf32>, vector<64x16xf32> -> vector<64x16xf32>
    %37 = tpu.concatenate %34, %36 in 1 : vector<64x16xf32>, vector<64x16xf32> -> vector<64x32xf32>
    %c0_35 = arith.constant 0 : index
    %c0_36 = arith.constant 0 : index
    %38 = vector.load %arg4[%c0_35, %c0_36] : memref<32x64xf32, #tpu.memory_space<vmem>>, vector<32x64xf32>
    %cst_37 = arith.constant dense<0.000000e+00> : vector<32x32xf32>
    %39 = tpu.matmul %38, %37, %cst_37 {dimension_numbers = #tpu.dot_dimension_numbers<[1], [0], [0], [1], [0, 0, 1, 1], [], []>} : vector<32x64xf32>, vector<64x32xf32>, vector<32x32xf32> -> vector<32x32xf32>
    %40 = vector.extract_strided_slice %39 {offsets = [0, 0], sizes = [32, 16], strides = [1, 1]} : vector<32x32xf32> to vector<32x16xf32>
    %cst_38 = arith.constant 3.125000e-02 : f32
    %41 = vector.broadcast %cst_38 : f32 to vector<32x16xf32>
    %42 = arith.mulf %40, %41 : vector<32x16xf32>
    %43 = vector.extract_strided_slice %39 {offsets = [0, 16], sizes = [32, 16], strides = [1, 1]} : vector<32x32xf32> to vector<32x16xf32>
    %cst_39 = arith.constant 3.125000e-02 : f32
    %44 = vector.broadcast %cst_39 : f32 to vector<32x16xf32>
    %45 = arith.mulf %43, %44 : vector<32x16xf32>
    %46 = arith.mulf %42, %42 : vector<32x16xf32>
    %47 = arith.subf %45, %46 : vector<32x16xf32>
    %cst_40 = arith.constant 0.000000e+00 : f32
    %48 = vector.broadcast %cst_40 : f32 to vector<32x16xf32>
    %49 = arith.maximumf %47, %48 : vector<32x16xf32>
    %cst_41 = arith.constant 9.99999974E-6 : f32
    %50 = vector.broadcast %cst_41 : f32 to vector<32x16xf32>
    %51 = arith.addf %49, %50 : vector<32x16xf32>
    %52 = math.rsqrt %51 : vector<32x16xf32>
    %53 = tpu.concatenate %42, %52 in 0 : vector<32x16xf32>, vector<32x16xf32> -> vector<64x16xf32>
    %c0_42 = arith.constant 0 : index
    %c0_43 = arith.constant 0 : index
    %54 = vector.load %arg5[%c0_42, %c0_43] : memref<128x64xf32, #tpu.memory_space<vmem>>, vector<128x64xf32>
    %cst_44 = arith.constant dense<0.000000e+00> : vector<128x16xf32>
    %55 = tpu.matmul %54, %53, %cst_44 {dimension_numbers = #tpu.dot_dimension_numbers<[1], [0], [0], [1], [0, 0, 1, 1], [], []>} : vector<128x64xf32>, vector<64x16xf32>, vector<128x16xf32> -> vector<128x16xf32>
    %c0_45 = arith.constant 0 : index
    %c0_46 = arith.constant 0 : index
    %56 = vector.load %arg3[%c0_45, %c0_46] : memref<16x256xf32, #tpu.memory_space<vmem>>, vector<16x256xf32>
    %cst_47 = arith.constant dense<0.000000e+00> : vector<128x256xf32>
    %57 = tpu.matmul %55, %56, %cst_47 {dimension_numbers = #tpu.dot_dimension_numbers<[1], [0], [0], [1], [0, 0, 1, 1], [], []>} : vector<128x16xf32>, vector<16x256xf32>, vector<128x256xf32> -> vector<128x256xf32>
    %58 = vector.extract_strided_slice %57 {offsets = [0, 0], sizes = [64, 256], strides = [1, 1]} : vector<128x256xf32> to vector<64x256xf32>
    %59 = vector.extract_strided_slice %57 {offsets = [64, 0], sizes = [64, 256], strides = [1, 1]} : vector<128x256xf32> to vector<64x256xf32>
    %60 = arith.subf %32, %58 : vector<64x256xf32>
    %61 = arith.mulf %60, %59 : vector<64x256xf32>
    %c0_48 = arith.constant 0 : index
    %c0_49 = arith.constant 0 : index
    %62 = vector.load %arg6[%c0_48, %c0_49] : memref<64x1xf32, #tpu.memory_space<vmem>>, vector<64x1xf32>
    %63 = vector.broadcast %62 : vector<64x1xf32> to vector<64x256xf32>
    %64 = arith.addf %61, %63 : vector<64x256xf32>
    %65 = arith.negf %64 : vector<64x256xf32>
    %66 = math.exp %65 : vector<64x256xf32>
    %cst_50 = arith.constant 1.000000e+00 : f32
    %67 = vector.broadcast %cst_50 : f32 to vector<64x256xf32>
    %68 = arith.addf %67, %66 : vector<64x256xf32>
    %69 = arith.divf %67, %68 : vector<64x256xf32>
    %70 = arith.mulf %64, %69 : vector<64x256xf32>
    %c1_i32 = arith.constant 1 : i32
    %71 = tpu.dynamic_rotate %70 by %c1_i32 dim 1 : vector<64x256xf32>, i32 -> vector<64x256xf32>
    %c0_51 = arith.constant 0 : index
    %c0_52 = arith.constant 0 : index
    %72 = vector.load %arg9[%c0_51, %c0_52] : memref<1x256xf32, #tpu.memory_space<vmem>>, vector<1x256xf32>
    %73 = vector.broadcast %72 : vector<1x256xf32> to vector<64x256xf32>
    %74 = arith.mulf %71, %73 : vector<64x256xf32>
    %c255_i32 = arith.constant 255 : i32
    %75 = tpu.dynamic_rotate %70 by %c255_i32 dim 1 : vector<64x256xf32>, i32 -> vector<64x256xf32>
    %c0_53 = arith.constant 0 : index
    %c0_54 = arith.constant 0 : index
    %76 = vector.load %arg10[%c0_53, %c0_54] : memref<1x256xf32, #tpu.memory_space<vmem>>, vector<1x256xf32>
    %77 = vector.broadcast %76 : vector<1x256xf32> to vector<64x256xf32>
    %78 = arith.mulf %75, %77 : vector<64x256xf32>
    %79 = tpu.concatenate %74, %70, %78 in 0 : vector<64x256xf32>, vector<64x256xf32>, vector<64x256xf32> -> vector<192x256xf32>
    %c0_55 = arith.constant 0 : index
    %c0_56 = arith.constant 0 : index
    %80 = vector.load %arg7[%c0_55, %c0_56] : memref<32x192xf32, #tpu.memory_space<vmem>>, vector<32x192xf32>
    %cst_57 = arith.constant dense<0.000000e+00> : vector<32x256xf32>
    %81 = tpu.matmul %80, %79, %cst_57 {dimension_numbers = #tpu.dot_dimension_numbers<[1], [0], [0], [1], [0, 0, 1, 1], [], []>} : vector<32x192xf32>, vector<192x256xf32>, vector<32x256xf32> -> vector<32x256xf32>
    %c0_58 = arith.constant 0 : index
    %c0_59 = arith.constant 0 : index
    %82 = vector.load %arg8[%c0_58, %c0_59] : memref<32x1xf32, #tpu.memory_space<vmem>>, vector<32x1xf32>
    %83 = vector.broadcast %82 : vector<32x1xf32> to vector<32x256xf32>
    %84 = arith.addf %81, %83 : vector<32x256xf32>
    %85 = vector.extract_strided_slice %84 {offsets = [0, 0], sizes = [32, 16], strides = [1, 1]} : vector<32x256xf32> to vector<32x16xf32>
    %c0_60 = arith.constant 0 : index
    %c0_61 = arith.constant 0 : index
    %c0_62 = arith.constant 0 : index
    %86 = vector.load %arg11[%c0_60, %c0_61, %c0_62] : memref<16x32x16xf32, #tpu.memory_space<vmem>>, vector<1x32x16xf32>
    %87 = vector.shape_cast %86 : vector<1x32x16xf32> to vector<32x16xf32>
    %88 = vector.shape_cast %85 : vector<32x16xf32> to vector<1x32x16xf32>
    tpu.vector_store %arg11[%c0_60, %c0_61, %c0_62], %88 {strides = array<i32>} : memref<16x32x16xf32, #tpu.memory_space<vmem>>, vector<1x32x16xf32>,
    %89 = vector.extract_strided_slice %84 {offsets = [0, 16], sizes = [32, 16], strides = [1, 1]} : vector<32x256xf32> to vector<32x16xf32>
    %c1_63 = arith.constant 1 : index
    %c0_64 = arith.constant 0 : index
    %c0_65 = arith.constant 0 : index
    %90 = vector.load %arg11[%c1_63, %c0_64, %c0_65] : memref<16x32x16xf32, #tpu.memory_space<vmem>>, vector<1x32x16xf32>
    %91 = vector.shape_cast %90 : vector<1x32x16xf32> to vector<32x16xf32>
    %92 = vector.shape_cast %89 : vector<32x16xf32> to vector<1x32x16xf32>
    tpu.vector_store %arg11[%c1_63, %c0_64, %c0_65], %92 {strides = array<i32>} : memref<16x32x16xf32, #tpu.memory_space<vmem>>, vector<1x32x16xf32>,
    %93 = vector.extract_strided_slice %84 {offsets = [0, 32], sizes = [32, 16], strides = [1, 1]} : vector<32x256xf32> to vector<32x16xf32>
    %c2_66 = arith.constant 2 : index
    %c0_67 = arith.constant 0 : index
    %c0_68 = arith.constant 0 : index
    %94 = vector.load %arg11[%c2_66, %c0_67, %c0_68] : memref<16x32x16xf32, #tpu.memory_space<vmem>>, vector<1x32x16xf32>
    %95 = vector.shape_cast %94 : vector<1x32x16xf32> to vector<32x16xf32>
    %96 = vector.shape_cast %93 : vector<32x16xf32> to vector<1x32x16xf32>
    tpu.vector_store %arg11[%c2_66, %c0_67, %c0_68], %96 {strides = array<i32>} : memref<16x32x16xf32, #tpu.memory_space<vmem>>, vector<1x32x16xf32>,
    %97 = vector.extract_strided_slice %84 {offsets = [0, 48], sizes = [32, 16], strides = [1, 1]} : vector<32x256xf32> to vector<32x16xf32>
    %c3_69 = arith.constant 3 : index
    %c0_70 = arith.constant 0 : index
    %c0_71 = arith.constant 0 : index
    %98 = vector.load %arg11[%c3_69, %c0_70, %c0_71] : memref<16x32x16xf32, #tpu.memory_space<vmem>>, vector<1x32x16xf32>
    %99 = vector.shape_cast %98 : vector<1x32x16xf32> to vector<32x16xf32>
    %100 = vector.shape_cast %97 : vector<32x16xf32> to vector<1x32x16xf32>
    tpu.vector_store %arg11[%c3_69, %c0_70, %c0_71], %100 {strides = array<i32>} : memref<16x32x16xf32, #tpu.memory_space<vmem>>, vector<1x32x16xf32>,
    %101 = vector.extract_strided_slice %84 {offsets = [0, 64], sizes = [32, 16], strides = [1, 1]} : vector<32x256xf32> to vector<32x16xf32>
    %c4_72 = arith.constant 4 : index
    %c0_73 = arith.constant 0 : index
    %c0_74 = arith.constant 0 : index
    %102 = vector.load %arg11[%c4_72, %c0_73, %c0_74] : memref<16x32x16xf32, #tpu.memory_space<vmem>>, vector<1x32x16xf32>
    %103 = vector.shape_cast %102 : vector<1x32x16xf32> to vector<32x16xf32>
    %104 = vector.shape_cast %101 : vector<32x16xf32> to vector<1x32x16xf32>
    tpu.vector_store %arg11[%c4_72, %c0_73, %c0_74], %104 {strides = array<i32>} : memref<16x32x16xf32, #tpu.memory_space<vmem>>, vector<1x32x16xf32>,
    %105 = vector.extract_strided_slice %84 {offsets = [0, 80], sizes = [32, 16], strides = [1, 1]} : vector<32x256xf32> to vector<32x16xf32>
    %c5_75 = arith.constant 5 : index
    %c0_76 = arith.constant 0 : index
    %c0_77 = arith.constant 0 : index
    %106 = vector.load %arg11[%c5_75, %c0_76, %c0_77] : memref<16x32x16xf32, #tpu.memory_space<vmem>>, vector<1x32x16xf32>
    %107 = vector.shape_cast %106 : vector<1x32x16xf32> to vector<32x16xf32>
    %108 = vector.shape_cast %105 : vector<32x16xf32> to vector<1x32x16xf32>
    tpu.vector_store %arg11[%c5_75, %c0_76, %c0_77], %108 {strides = array<i32>} : memref<16x32x16xf32, #tpu.memory_space<vmem>>, vector<1x32x16xf32>,
    %109 = vector.extract_strided_slice %84 {offsets = [0, 96], sizes = [32, 16], strides = [1, 1]} : vector<32x256xf32> to vector<32x16xf32>
    %c6_78 = arith.constant 6 : index
    %c0_79 = arith.constant 0 : index
    %c0_80 = arith.constant 0 : index
    %110 = vector.load %arg11[%c6_78, %c0_79, %c0_80] : memref<16x32x16xf32, #tpu.memory_space<vmem>>, vector<1x32x16xf32>
    %111 = vector.shape_cast %110 : vector<1x32x16xf32> to vector<32x16xf32>
    %112 = vector.shape_cast %109 : vector<32x16xf32> to vector<1x32x16xf32>
    tpu.vector_store %arg11[%c6_78, %c0_79, %c0_80], %112 {strides = array<i32>} : memref<16x32x16xf32, #tpu.memory_space<vmem>>, vector<1x32x16xf32>,
    %113 = vector.extract_strided_slice %84 {offsets = [0, 112], sizes = [32, 16], strides = [1, 1]} : vector<32x256xf32> to vector<32x16xf32>
    %c7_81 = arith.constant 7 : index
    %c0_82 = arith.constant 0 : index
    %c0_83 = arith.constant 0 : index
    %114 = vector.load %arg11[%c7_81, %c0_82, %c0_83] : memref<16x32x16xf32, #tpu.memory_space<vmem>>, vector<1x32x16xf32>
    %115 = vector.shape_cast %114 : vector<1x32x16xf32> to vector<32x16xf32>
    %116 = vector.shape_cast %113 : vector<32x16xf32> to vector<1x32x16xf32>
    tpu.vector_store %arg11[%c7_81, %c0_82, %c0_83], %116 {strides = array<i32>} : memref<16x32x16xf32, #tpu.memory_space<vmem>>, vector<1x32x16xf32>,
    %117 = vector.extract_strided_slice %84 {offsets = [0, 128], sizes = [32, 16], strides = [1, 1]} : vector<32x256xf32> to vector<32x16xf32>
    %c8_84 = arith.constant 8 : index
    %c0_85 = arith.constant 0 : index
    %c0_86 = arith.constant 0 : index
    %118 = vector.load %arg11[%c8_84, %c0_85, %c0_86] : memref<16x32x16xf32, #tpu.memory_space<vmem>>, vector<1x32x16xf32>
    %119 = vector.shape_cast %118 : vector<1x32x16xf32> to vector<32x16xf32>
    %120 = vector.shape_cast %117 : vector<32x16xf32> to vector<1x32x16xf32>
    tpu.vector_store %arg11[%c8_84, %c0_85, %c0_86], %120 {strides = array<i32>} : memref<16x32x16xf32, #tpu.memory_space<vmem>>, vector<1x32x16xf32>,
    %121 = vector.extract_strided_slice %84 {offsets = [0, 144], sizes = [32, 16], strides = [1, 1]} : vector<32x256xf32> to vector<32x16xf32>
    %c9_87 = arith.constant 9 : index
    %c0_88 = arith.constant 0 : index
    %c0_89 = arith.constant 0 : index
    %122 = vector.load %arg11[%c9_87, %c0_88, %c0_89] : memref<16x32x16xf32, #tpu.memory_space<vmem>>, vector<1x32x16xf32>
    %123 = vector.shape_cast %122 : vector<1x32x16xf32> to vector<32x16xf32>
    %124 = vector.shape_cast %121 : vector<32x16xf32> to vector<1x32x16xf32>
    tpu.vector_store %arg11[%c9_87, %c0_88, %c0_89], %124 {strides = array<i32>} : memref<16x32x16xf32, #tpu.memory_space<vmem>>, vector<1x32x16xf32>,
    %125 = vector.extract_strided_slice %84 {offsets = [0, 160], sizes = [32, 16], strides = [1, 1]} : vector<32x256xf32> to vector<32x16xf32>
    %c10_90 = arith.constant 10 : index
    %c0_91 = arith.constant 0 : index
    %c0_92 = arith.constant 0 : index
    %126 = vector.load %arg11[%c10_90, %c0_91, %c0_92] : memref<16x32x16xf32, #tpu.memory_space<vmem>>, vector<1x32x16xf32>
    %127 = vector.shape_cast %126 : vector<1x32x16xf32> to vector<32x16xf32>
    %128 = vector.shape_cast %125 : vector<32x16xf32> to vector<1x32x16xf32>
    tpu.vector_store %arg11[%c10_90, %c0_91, %c0_92], %128 {strides = array<i32>} : memref<16x32x16xf32, #tpu.memory_space<vmem>>, vector<1x32x16xf32>,
    %129 = vector.extract_strided_slice %84 {offsets = [0, 176], sizes = [32, 16], strides = [1, 1]} : vector<32x256xf32> to vector<32x16xf32>
    %c11_93 = arith.constant 11 : index
    %c0_94 = arith.constant 0 : index
    %c0_95 = arith.constant 0 : index
    %130 = vector.load %arg11[%c11_93, %c0_94, %c0_95] : memref<16x32x16xf32, #tpu.memory_space<vmem>>, vector<1x32x16xf32>
    %131 = vector.shape_cast %130 : vector<1x32x16xf32> to vector<32x16xf32>
    %132 = vector.shape_cast %129 : vector<32x16xf32> to vector<1x32x16xf32>
    tpu.vector_store %arg11[%c11_93, %c0_94, %c0_95], %132 {strides = array<i32>} : memref<16x32x16xf32, #tpu.memory_space<vmem>>, vector<1x32x16xf32>,
    %133 = vector.extract_strided_slice %84 {offsets = [0, 192], sizes = [32, 16], strides = [1, 1]} : vector<32x256xf32> to vector<32x16xf32>
    %c12_96 = arith.constant 12 : index
    %c0_97 = arith.constant 0 : index
    %c0_98 = arith.constant 0 : index
    %134 = vector.load %arg11[%c12_96, %c0_97, %c0_98] : memref<16x32x16xf32, #tpu.memory_space<vmem>>, vector<1x32x16xf32>
    %135 = vector.shape_cast %134 : vector<1x32x16xf32> to vector<32x16xf32>
    %136 = vector.shape_cast %133 : vector<32x16xf32> to vector<1x32x16xf32>
    tpu.vector_store %arg11[%c12_96, %c0_97, %c0_98], %136 {strides = array<i32>} : memref<16x32x16xf32, #tpu.memory_space<vmem>>, vector<1x32x16xf32>,
    %137 = vector.extract_strided_slice %84 {offsets = [0, 208], sizes = [32, 16], strides = [1, 1]} : vector<32x256xf32> to vector<32x16xf32>
    %c13_99 = arith.constant 13 : index
    %c0_100 = arith.constant 0 : index
    %c0_101 = arith.constant 0 : index
    %138 = vector.load %arg11[%c13_99, %c0_100, %c0_101] : memref<16x32x16xf32, #tpu.memory_space<vmem>>, vector<1x32x16xf32>
    %139 = vector.shape_cast %138 : vector<1x32x16xf32> to vector<32x16xf32>
    %140 = vector.shape_cast %137 : vector<32x16xf32> to vector<1x32x16xf32>
    tpu.vector_store %arg11[%c13_99, %c0_100, %c0_101], %140 {strides = array<i32>} : memref<16x32x16xf32, #tpu.memory_space<vmem>>, vector<1x32x16xf32>,
    %141 = vector.extract_strided_slice %84 {offsets = [0, 224], sizes = [32, 16], strides = [1, 1]} : vector<32x256xf32> to vector<32x16xf32>
    %c14_102 = arith.constant 14 : index
    %c0_103 = arith.constant 0 : index
    %c0_104 = arith.constant 0 : index
    %142 = vector.load %arg11[%c14_102, %c0_103, %c0_104] : memref<16x32x16xf32, #tpu.memory_space<vmem>>, vector<1x32x16xf32>
    %143 = vector.shape_cast %142 : vector<1x32x16xf32> to vector<32x16xf32>
    %144 = vector.shape_cast %141 : vector<32x16xf32> to vector<1x32x16xf32>
    tpu.vector_store %arg11[%c14_102, %c0_103, %c0_104], %144 {strides = array<i32>} : memref<16x32x16xf32, #tpu.memory_space<vmem>>, vector<1x32x16xf32>,
    %145 = vector.extract_strided_slice %84 {offsets = [0, 240], sizes = [32, 16], strides = [1, 1]} : vector<32x256xf32> to vector<32x16xf32>
    %c15_105 = arith.constant 15 : index
    %c0_106 = arith.constant 0 : index
    %c0_107 = arith.constant 0 : index
    %146 = vector.load %arg11[%c15_105, %c0_106, %c0_107] : memref<16x32x16xf32, #tpu.memory_space<vmem>>, vector<1x32x16xf32>
    %147 = vector.shape_cast %146 : vector<1x32x16xf32> to vector<32x16xf32>
    %148 = vector.shape_cast %145 : vector<32x16xf32> to vector<1x32x16xf32>
    tpu.vector_store %arg11[%c15_105, %c0_106, %c0_107], %148 {strides = array<i32>} : memref<16x32x16xf32, #tpu.memory_space<vmem>>, vector<1x32x16xf32>,
    return
  }
  func.func @transform_0(%arg0: i32) -> (i32, i32, i32) {
    %c0_i32 = arith.constant 0 : i32
    %c0_i32_0 = arith.constant 0 : i32
    %c0_i32_1 = arith.constant 0 : i32
    return %arg0, %c0_i32, %c0_i32_0 : i32, i32, i32
  }
  func.func @transform_1(%arg0: i32) -> (i32, i32) {
    %c0_i32 = arith.constant 0 : i32
    %c0_i32_0 = arith.constant 0 : i32
    %c0_i32_1 = arith.constant 0 : i32
    return %c0_i32, %c0_i32_0 : i32, i32
  }
  func.func @transform_2(%arg0: i32) -> (i32, i32) {
    %c0_i32 = arith.constant 0 : i32
    %c0_i32_0 = arith.constant 0 : i32
    %c0_i32_1 = arith.constant 0 : i32
    return %c0_i32, %c0_i32_0 : i32, i32
  }
  func.func @transform_3(%arg0: i32) -> (i32, i32) {
    %c0_i32 = arith.constant 0 : i32
    %c0_i32_0 = arith.constant 0 : i32
    %c0_i32_1 = arith.constant 0 : i32
    return %c0_i32, %c0_i32_0 : i32, i32
  }
  func.func @transform_4(%arg0: i32) -> (i32, i32) {
    %c0_i32 = arith.constant 0 : i32
    %c0_i32_0 = arith.constant 0 : i32
    %c0_i32_1 = arith.constant 0 : i32
    return %c0_i32, %c0_i32_0 : i32, i32
  }
  func.func @transform_5(%arg0: i32) -> (i32, i32) {
    %c0_i32 = arith.constant 0 : i32
    %c0_i32_0 = arith.constant 0 : i32
    %c0_i32_1 = arith.constant 0 : i32
    return %c0_i32, %c0_i32_0 : i32, i32
  }
  func.func @transform_6(%arg0: i32) -> (i32, i32) {
    %c0_i32 = arith.constant 0 : i32
    %c0_i32_0 = arith.constant 0 : i32
    %c0_i32_1 = arith.constant 0 : i32
    return %c0_i32, %c0_i32_0 : i32, i32
  }
  func.func @transform_7(%arg0: i32) -> (i32, i32) {
    %c0_i32 = arith.constant 0 : i32
    %c0_i32_0 = arith.constant 0 : i32
    %c0_i32_1 = arith.constant 0 : i32
    return %c0_i32, %c0_i32_0 : i32, i32
  }
  func.func @transform_8(%arg0: i32) -> (i32, i32) {
    %c0_i32 = arith.constant 0 : i32
    %c0_i32_0 = arith.constant 0 : i32
    %c0_i32_1 = arith.constant 0 : i32
    return %c0_i32, %c0_i32_0 : i32, i32
  }
  func.func @transform_9(%arg0: i32) -> (i32, i32) {
    %c0_i32 = arith.constant 0 : i32
    %c0_i32_0 = arith.constant 0 : i32
    %c0_i32_1 = arith.constant 0 : i32
    return %c0_i32, %c0_i32_0 : i32, i32
  }
  func.func @transform_10(%arg0: i32) -> (i32, i32, i32) {
    %c0_i32 = arith.constant 0 : i32
    %c0_i32_0 = arith.constant 0 : i32
    %c0_i32_1 = arith.constant 0 : i32
    return %arg0, %c0_i32, %c0_i32_0 : i32, i32, i32
  }
}

</mosaic_0001>

<bundles_post_ra>
// kernel: tpu_custom_call.1
= control target key start
LH: loop header
LB: loop body
LE: loop exit
PB: predicated region body
PF: predicated region fallthrough
CT: control target
= control target key end

     0   :  { %s3087_s17 = smov 32   ;;  %s3088_s18 = smov 16   ;;  %vm626_vm0 = vcmask 130048   ;;  %vm635_vm1 = vcmask 261120   ;;  %vm644_vm2 = vcmask 392192   ;;  %vm653_vm3 = vcmask 523264   ;;  %s4798_s0 = inlined_call_operand.vmem [shape: f32[16,64,16], index: 0, kind: input, shape index: {}]   ;;  %s4799_s1 = inlined_call_operand.vmem [shape: f32[256,16], index: 1, kind: input, shape index: {}]   ;;  %s4800_s3 = inlined_call_operand.vmem [shape: f32[32,64], index: 3, kind: input, shape index: {}]   ;;  %s4801_s4 = inlined_call_operand.vmem [shape: f32[128,64], index: 4, kind: input, shape index: {}]   ;;  %s4802_s2 = inlined_call_operand.vmem [shape: f32[16,256], index: 2, kind: input, shape index: {}]   ;;  %s4803_s5 = inlined_call_operand.vmem [shape: f32[64,1], index: 5, kind: input, shape index: {}]   ;;  %s4804_s7 = inlined_call_operand.vmem [shape: f32[32,1], index: 7, kind: input, shape index: {}]   ;;  %s4805_s6 = inlined_call_operand.vmem [shape: f32[32,192], index: 6, kind: input, shape index: {}]   ;;  %s4806_s8 = inlined_call_operand.vmem [shape: f32[1,256], index: 8, kind: input, shape index: {}]   ;;  %s4807_s9 = inlined_call_operand.vmem [shape: f32[1,256], index: 9, kind: input, shape index: {}]   ;;  %s4808_s10 = inlined_call_operand.vmem [shape: f32[16,32,16], index: 10, kind: output, shape index: {}]  }
   0x1   :  { %v2450_v0 = vld [vmem:[%s4798_s0 + $0x280] sm:$0xff]  ;;  %s3089_s27 = smov 48   ;;  %s3090_s12 = smov 64   ;;  %v2443_v9 = vld [vmem:[%s4798_s0 + $0x248] sm:$0xff]  ;;  %v763_v19 = vld [vmem:[%s4799_s1 + $0x90] sm:$0xff]  ;;  %vm662_vm4 = vcmask 654336  }
   0x2   :  { %v2442_v1 = vld [vmem:[%s4798_s0 + $0x240] sm:$0xff]  ;;  %442 = vrot.lane.b32.xlu1 %v2450_v0, %s3087_s17  ;;  %s3091_s19 = smov 80   ;;  %v2379_v11 = vld [vmem:[%s4798_s0 + $0x48] sm:$0xff]  ;;  %s3092_s23 = smov 96   ;;  %v764_v22 = vld [vmem:[%s4799_s1 + $0x98] sm:$0xff]  ;;  %vm671_vm5 = vcmask 785408  }
   0x3   :  { %410 = vrot.lane.b32.xlu0 %v2442_v1, %s3088_s18  ;;  %v2386_v2 = vld [vmem:[%s4798_s0 + $0x80] sm:$0xff]  ;;  %v2451_v13 = vld [vmem:[%s4798_s0 + $0x288] sm:$0xff]  ;;  %v2828_v24 = vpack.c.bf16 %v764_v22, %v763_v19  ;;  %v747_v25 = vld [vmem:[%s4799_s1 + $0x10] sm:$0xff]  ;;  %s3093_s26 = smov 112   ;;  %vm680_vm6 = vcmask 916480  }
   0x4   :  { %v2378_v3 = vld [vmem:[%s4798_s0 + $0x40] sm:$0xff]  ;;  %v762_v15 = vld [vmem:[%s4799_s1 + $0x88] sm:$0xff]  ;;  %v748_v26 = vld [vmem:[%s4799_s1 + $0x18] sm:$0xff] }
   0x5   :  { %v2394_v4 = vld [vmem:[%s4798_s0 + $0xc0] sm:$0xff]  ;;  %v746_v18 = vld [vmem:[%s4799_s1 + $0x8] sm:$0xff]  ;;  %v2830_v27 = vpack.c.bf16 %v748_v26, %v747_v25  ;;  %v767_v33 = vld [vmem:[%s4799_s1 + $0xb0] sm:$0xff] }
   0x6   :  { %218 = vrot.lane.b32.xlu1 %v2386_v2, %s3087_s17  ;;  %v2458_v5 = vld [vmem:[%s4798_s0 + $0x2c0] sm:$0xff]  ;;  %v2387_v23 = vld [vmem:[%s4798_s0 + $0x88] sm:$0xff]  ;;  %v768_v36 = vld [vmem:[%s4799_s1 + $0xb8] sm:$0xff] }
   0x7   :  { %186 = vrot.lane.b32.xlu0 %v2378_v3, %s3088_s18  ;;  %v2402_v6 = vld [vmem:[%s4798_s0 + $0x100] sm:$0xff]  ;;  %v766_v29 = vld [vmem:[%s4799_s1 + $0xa8] sm:$0xff]  ;;  %v2836_v38 = vpack.c.bf16 %v768_v36, %v767_v33  ;;  %v751_v39 = vld [vmem:[%s4799_s1 + $0x30] sm:$0xff] }
   0x8   :  { %v2466_v7 = vld [vmem:[%s4798_s0 + $0x300] sm:$0xff]  ;;  %v750_v32 = vld [vmem:[%s4799_s1 + $0x28] sm:$0xff]  ;;  %v752_v40 = vld [vmem:[%s4799_s1 + $0x38] sm:$0xff] }
   0x9   :  { %v2474_v8 = vld [vmem:[%s4798_s0 + $0x340] sm:$0xff]  ;;  %v2459_v35 = vld [vmem:[%s4798_s0 + $0x2c8] sm:$0xff]  ;;  %v2838_v45 = vpack.c.bf16 %v752_v40, %v751_v39  ;;  %v771_v49 = vld [vmem:[%s4799_s1 + $0xd0] sm:$0xff] }
   0xa   :  { %250 = vrot.lane.b32.xlu1 %v2394_v4, %s3089_s27  ;;  %v2410_v10 = vld [vmem:[%s4798_s0 + $0x140] sm:$0xff]  ;;  %v770_v42 = vld [vmem:[%s4799_s1 + $0xc8] sm:$0xff]  ;;  %v772_v50 = vld [vmem:[%s4799_s1 + $0xd8] sm:$0xff] }
   0xb   :  { %474 = vrot.lane.b32.xlu0 %v2458_v5, %s3089_s27  ;;  %v2482_v12 = vld [vmem:[%s4798_s0 + $0x380] sm:$0xff]  ;;  %v2395_v44 = vld [vmem:[%s4798_s0 + $0xc8] sm:$0xff]  ;;  %v2844_v54 = vpack.c.bf16 %v772_v50, %v771_v49  ;;  %v755_v55 = vld [vmem:[%s4799_s1 + $0x50] sm:$0xff] }
   0xc   :  { %v761_v14 = vld [vmem:[%s4799_s1 + $0x80] sm:$0xff]  ;;  %v754_v48 = vld [vmem:[%s4799_s1 + $0x48] sm:$0xff]  ;;  %v756_v56 = vld [vmem:[%s4799_s1 + $0x58] sm:$0xff] }
   0xd   :  { %v2824_v16 = vpack.c.bf16 %v762_v15, %v761_v14  ;;  %v745_v17 = vld [vmem:[%s4799_s1] sm:$0xff]  ;;  %v2403_v51 = vld [vmem:[%s4798_s0 + $0x108] sm:$0xff]  ;;  %v2444_v60 = vld [vmem:[%s4798_s0 + $0x250] sm:$0xff]  ;;  %v2846_v61 = vpack.c.bf16 %v756_v56, %v755_v55 }
   0xe   :  { %282 = vrot.lane.b32.xlu1 %v2402_v6, %s3090_s12  ;;  %v2418_v20 = vld [vmem:[%s4798_s0 + $0x180] sm:$0xff]  ;;  %v2826_v21 = vpack.c.bf16 %v746_v18, %v745_v17  ;;  %v2467_v52 = vld [vmem:[%s4798_s0 + $0x308] sm:$0xff]  ;;  %v775_v1 = vld [vmem:[%s4799_s1 + $0xf0] sm:$0xff] }
   0xf   :  { %506 = vrot.lane.b32.xlu0 %v2466_v7, %s3090_s12  ;;  %2825 = vmatprep.subr.bf16.mxu0 %v2824_v16  ;;  %v765_v28 = vld [vmem:[%s4799_s1 + $0xa0] sm:$0xff]  ;;  %v774_v58 = vld [vmem:[%s4799_s1 + $0xe8] sm:$0xff]  ;;  %v776_v2 = vld [vmem:[%s4799_s1 + $0xf8] sm:$0xff] }
  0x10   :  { %2857 = vmatprep.subr.bf16.mxu1 %v2824_v16  ;;  %2827 = vmatpush3.bf16.msra.mxu0 %v2826_v21  ;;  %v2832_v30 = vpack.c.bf16 %v766_v29, %v765_v28  ;;  %v749_v31 = vld [vmem:[%s4799_s1 + $0x20] sm:$0xff]  ;;  %v2475_v59 = vld [vmem:[%s4798_s0 + $0x348] sm:$0xff]  ;;  %v2380_v4 = vld [vmem:[%s4798_s0 + $0x50] sm:$0xff]  ;;  %v2852_v6 = vpack.c.bf16 %v776_v2, %v775_v1 }
  0x11   :  { %2859 = vmatpush3.bf16.msra.mxu1 %v2826_v21  ;;  %2829 = vmatprep.subr.bf16.mxu0 %v2828_v24  ;;  %v2490_v34 = vld [vmem:[%s4798_s0 + $0x3c0] sm:$0xff]  ;;  %v2834_v37 = vpack.c.bf16 %v750_v32, %v749_v31  ;;  %v758_v0 = vld [vmem:[%s4799_s1 + $0x68] sm:$0xff]  ;;  %v759_v7 = vld [vmem:[%s4799_s1 + $0x70] sm:$0xff] }
  0x12   :  { %538 = vrot.lane.b32.xlu1 %v2474_v8, %s3091_s19  ;;  %2861 = vmatprep.subr.bf16.mxu1 %v2828_v24  ;;  %v769_v41 = vld [vmem:[%s4799_s1 + $0xc0] sm:$0xff]  ;;  %v2411_v3 = vld [vmem:[%s4798_s0 + $0x148] sm:$0xff]  ;;  %v760_v8 = vld [vmem:[%s4799_s1 + $0x78] sm:$0xff] }
  0x13   :  { %412 = vrot.lane.b32.xlu0 %v2443_v9, %s3088_s18  ;;  %v2426_v43 = vld [vmem:[%s4798_s0 + $0x1c0] sm:$0xff]  ;;  %v2840_v46 = vpack.c.bf16 %v770_v42, %v769_v41  ;;  %v2483_v9 = vld [vmem:[%s4798_s0 + $0x388] sm:$0xff]  ;;  %v2460_v15 = vld [vmem:[%s4798_s0 + $0x2d0] sm:$0xff] }
  0x14   :  { %2831 = vmatpush3.bf16.msra.mxu0 %v2830_v27  ;;  %v753_v47 = vld [vmem:[%s4799_s1 + $0x40] sm:$0xff]  ;;  %v2491_v14 = vld [vmem:[%s4798_s0 + $0x3c8] sm:$0xff]  ;;  %v2396_v17 = vld [vmem:[%s4798_s0 + $0xd0] sm:$0xff] }
  0x15   :  { %2863 = vmatpush3.bf16.msra.mxu1 %v2830_v27  ;;  %2833 = vmatprep.subr.bf16.mxu0 %v2832_v30  ;;  %v2842_v53 = vpack.c.bf16 %v754_v48, %v753_v47  ;;  %v773_v57 = vld [vmem:[%s4799_s1 + $0xe0] sm:$0xff]  ;;  %v2427_v16 = vld [vmem:[%s4798_s0 + $0x1c8] sm:$0xff]  ;;  %v2404_v18 = vld [vmem:[%s4798_s0 + $0x110] sm:$0xff] }
  0x16   :  { %314 = vrot.lane.b32.xlu1 %v2410_v10, %s3091_s19  ;;  %2865 = vmatprep.subr.bf16.mxu1 %v2832_v30  ;;  %v2848_v62 = vpack.c.bf16 %v774_v58, %v773_v57  ;;  %v757_v63 = vld [vmem:[%s4799_s1 + $0x60] sm:$0xff]  ;;  %v2452_v10 = vld [vmem:[%s4798_s0 + $0x290] sm:$0xff]  ;;  %v2445_v21 = vld [vmem:[%s4798_s0 + $0x258] sm:$0xff]  ;;  %s3097_s1 = smov 127  }
  0x17   :  { %188 = vrot.lane.b32.xlu0 %v2379_v11, %s3088_s18  ;;  %v2850_v5 = vpack.c.bf16 %v758_v0, %v757_v63  ;;  %v2854_v11 = vpack.c.bf16 %v760_v8, %v759_v7  ;;  %v2468_v19 = vld [vmem:[%s4798_s0 + $0x310] sm:$0xff]  ;;  %v2453_v25 = vld [vmem:[%s4798_s0 + $0x298] sm:$0xff]  ;;  %v2454_v39 = vld [vmem:[%s4798_s0 + $0x2a0] sm:$0xff] }
  0x18   :  { %2835 = vmatpush3.bf16.msra.mxu0 %v2834_v37  ;;  %v2412_v22 = vld [vmem:[%s4798_s0 + $0x150] sm:$0xff]  ;;  %v2389_v27 = vld [vmem:[%s4798_s0 + $0x98] sm:$0xff]  ;;  %v2390_v41 = vld [vmem:[%s4798_s0 + $0xa0] sm:$0xff] }
  0x19   :  { %2867 = vmatpush3.bf16.msra.mxu1 %v2834_v37  ;;  %2837 = vmatprep.subr.bf16.mxu0 %v2836_v38  ;;  %v2484_v24 = vld [vmem:[%s4798_s0 + $0x390] sm:$0xff]  ;;  %v2461_v29 = vld [vmem:[%s4798_s0 + $0x2d8] sm:$0xff]  ;;  %v2382_v37 = vld [vmem:[%s4798_s0 + $0x60] sm:$0xff] }
  0x1a   :  { %570 = vrot.lane.b32.xlu1 %v2482_v12, %s3092_s23  ;;  %2869 = vmatprep.subr.bf16.mxu1 %v2836_v38  ;;  %v2419_v12 = vld [vmem:[%s4798_s0 + $0x188] sm:$0xff]  ;;  %v2420_v26 = vld [vmem:[%s4798_s0 + $0x190] sm:$0xff]  ;;  %v2397_v31 = vld [vmem:[%s4798_s0 + $0xd8] sm:$0xff] }
  0x1b   :  { %444 = vrot.lane.b32.xlu0 %v2451_v13, %s3087_s17  ;;  %v2388_v13 = vld [vmem:[%s4798_s0 + $0x90] sm:$0xff]  ;;  %v2405_v32 = vld [vmem:[%s4798_s0 + $0x118] sm:$0xff]  ;;  %v2398_v47 = vld [vmem:[%s4798_s0 + $0xe0] sm:$0xff] }
  0x1c   :  { %2839 = vmatpush3.bf16.msra.mxu0 %v2838_v45  ;;  %v2492_v28 = vld [vmem:[%s4798_s0 + $0x3d0] sm:$0xff]  ;;  %v2469_v33 = vld [vmem:[%s4798_s0 + $0x318] sm:$0xff]  ;;  %v2406_v50 = vld [vmem:[%s4798_s0 + $0x120] sm:$0xff] }
  0x1d   :  { %2871 = vmatpush3.bf16.msra.mxu1 %v2838_v45  ;;  %2841 = vmatprep.subr.bf16.mxu0 %v2840_v46  ;;  %v2428_v30 = vld [vmem:[%s4798_s0 + $0x1d0] sm:$0xff]  ;;  %v2413_v36 = vld [vmem:[%s4798_s0 + $0x158] sm:$0xff]  ;;  %v2447_v55 = vld [vmem:[%s4798_s0 + $0x268] sm:$0xff] }
  0x1e   :  { %346 = vrot.lane.b32.xlu1 %v2418_v20, %s3092_s23  ;;  %2873 = vmatprep.subr.bf16.mxu1 %v2840_v46  ;;  %v2476_v20 = vld [vmem:[%s4798_s0 + $0x350] sm:$0xff]  ;;  %v2485_v38 = vld [vmem:[%s4798_s0 + $0x398] sm:$0xff]  ;;  %v2414_v58 = vld [vmem:[%s4798_s0 + $0x160] sm:$0xff] }
  0x1f   :  { %220 = vrot.lane.b32.xlu0 %v2387_v23, %s3087_s17  ;;  %v2381_v23 = vld [vmem:[%s4798_s0 + $0x58] sm:$0xff]  ;;  %v2455_v63 = vld [vmem:[%s4798_s0 + $0x2a8] sm:$0xff]  ;;  %v2434_v2 = vld [vmem:[%s4798_s0 + $0x200] sm:$0xff] }
  0x20   :  { %2843 = vmatpush3.bf16.msra.mxu0 %v2842_v53  ;;  %v2421_v40 = vld [vmem:[%s4798_s0 + $0x198] sm:$0xff]  ;;  %v35_v8 = vld [vmem:[%s4798_s0] sm:$0xff] }
  0x21   :  { %2875 = vmatpush3.bf16.msra.mxu1 %v2842_v53  ;;  %2845 = vmatprep.subr.bf16.mxu0 %v2844_v54  ;;  %v2493_v42 = vld [vmem:[%s4798_s0 + $0x3d8] sm:$0xff] }
  0x22   :  { %602 = vrot.lane.b32.xlu1 %v2490_v34, %s3093_s26  ;;  %2877 = vmatprep.subr.bf16.mxu1 %v2844_v54  ;;  %v2477_v34 = vld [vmem:[%s4798_s0 + $0x358] sm:$0xff]  ;;  %v2478_v54 = vld [vmem:[%s4798_s0 + $0x360] sm:$0xff] }
  0x23   :  { %476 = vrot.lane.b32.xlu0 %v2459_v35, %s3089_s27  ;;  %v2446_v35 = vld [vmem:[%s4798_s0 + $0x260] sm:$0xff]  ;;  %v2429_v46 = vld [vmem:[%s4798_s0 + $0x1d8] sm:$0xff] }
  0x24   :  { %2847 = vmatpush3.bf16.msra.mxu0 %v2846_v61 }
  0x25   :  { %2879 = vmatpush3.bf16.msra.mxu1 %v2846_v61  ;;  %2849 = vmatprep.subr.bf16.mxu0 %v2848_v62 }
  0x26   :  { %378 = vrot.lane.b32.xlu1 %v2426_v43, %s3093_s26  ;;  %2881 = vmatprep.subr.bf16.mxu1 %v2848_v62  ;;  %v2462_v43 = vld [vmem:[%s4798_s0 + $0x2e0] sm:$0xff] }
  0x27   :  { %252 = vrot.lane.b32.xlu0 %v2395_v44, %s3089_s27  ;;  %v2486_v62 = vld [vmem:[%s4798_s0 + $0x3a0] sm:$0xff] }
  0x28   :  { %2851 = vmatpush3.bf16.msra.mxu0 %v2850_v5 }
  0x29   :  { %2883 = vmatpush3.bf16.msra.mxu1 %v2850_v5  ;;  %2853 = vmatprep.subr.bf16.mxu0 %v2852_v6 }
  0x2a   :  { %284 = vrot.lane.b32.xlu1 %v2403_v51, %s3090_s12  ;;  %2885 = vmatprep.subr.bf16.mxu1 %v2852_v6  ;;  %v2470_v51 = vld [vmem:[%s4798_s0 + $0x320] sm:$0xff] }
  0x2b   :  { %508 = vrot.lane.b32.xlu0 %v2467_v52, %s3090_s12 }
  0x2c   :  { %2855 = vmatpush3.bf16.msra.mxu0 %v2854_v11 }
  0x2d   :  { %2887 = vmatpush3.bf16.msra.mxu1 %v2854_v11 }
  0x2e   :  { %540 = vrot.lane.b32.xlu1 %v2475_v59, %s3091_s19  ;;  %v2383_v59 = vld [vmem:[%s4798_s0 + $0x68] sm:$0xff] }
  0x2f   :  { %414 = vrot.lane.b32.xlu0 %v2444_v60, %s3088_s18 }
  0x32   :  { %316 = vrot.lane.b32.xlu1 %v2411_v3, %s3091_s19  ;;  %v2422_v3 = vld [vmem:[%s4798_s0 + $0x1a0] sm:$0xff] }
  0x33   :  { %190 = vrot.lane.b32.xlu0 %v2380_v4, %s3088_s18  ;;  %v2391_v4 = vld [vmem:[%s4798_s0 + $0xa8] sm:$0xff] }
  0x36   :  { %572 = vrot.lane.b32.xlu1 %v2483_v9, %s3092_s23  ;;  %v2494_v9 = vld [vmem:[%s4798_s0 + $0x3e0] sm:$0xff] }
  0x37   :  { %446 = vrot.lane.b32.xlu0 %v2452_v10, %s3087_s17  ;;  %v2463_v10 = vld [vmem:[%s4798_s0 + $0x2e8] sm:$0xff] }
  0x3a   :  { %348 = vrot.lane.b32.xlu1 %v2419_v12, %s3092_s23 }
  0x3b   :  { %222 = vrot.lane.b32.xlu0 %v2388_v13, %s3087_s17 }
  0x3e   :  { %604 = vrot.lane.b32.xlu1 %v2491_v14, %s3093_s26 }
  0x3f   :  { %478 = vrot.lane.b32.xlu0 %v2460_v15, %s3089_s27 }
  0x42   :  { %380 = vrot.lane.b32.xlu1 %v2427_v16, %s3093_s26 }
  0x43   :  { %254 = vrot.lane.b32.xlu0 %v2396_v17, %s3089_s27 }
  0x46   :  { %286 = vrot.lane.b32.xlu1 %v2404_v18, %s3090_s12  ;;  %v2430_v18 = vld [vmem:[%s4798_s0 + $0x1e0] sm:$0xff] }
  0x47   :  { %510 = vrot.lane.b32.xlu0 %v2468_v19, %s3090_s12  ;;  %v2399_v19 = vld [vmem:[%s4798_s0 + $0xe8] sm:$0xff] }
  0x4a   :  { %542 = vrot.lane.b32.xlu1 %v2476_v20, %s3091_s19 }
  0x4b   :  { %416 = vrot.lane.b32.xlu0 %v2445_v21, %s3088_s18 }
  0x4e   :  { %318 = vrot.lane.b32.xlu1 %v2412_v22, %s3091_s19 }
  0x4f   :  { %192 = vrot.lane.b32.xlu0 %v2381_v23, %s3088_s18 }
  0x52   :  { %574 = vrot.lane.b32.xlu1 %v2484_v24, %s3092_s23 }
  0x53   :  { %448 = vrot.lane.b32.xlu0 %v2453_v25, %s3087_s17 }
  0x56   :  { %350 = vrot.lane.b32.xlu1 %v2420_v26, %s3092_s23 }
  0x57   :  { %224 = vrot.lane.b32.xlu0 %v2389_v27, %s3087_s17 }
  0x5a   :  { %606 = vrot.lane.b32.xlu1 %v2492_v28, %s3093_s26 }
  0x5b   :  { %480 = vrot.lane.b32.xlu0 %v2461_v29, %s3089_s27  ;;  %v2407_v29 = vld [vmem:[%s4798_s0 + $0x128] sm:$0xff] }
  0x5e   :  { %382 = vrot.lane.b32.xlu1 %v2428_v30, %s3093_s26  ;;  %v2471_v30 = vld [vmem:[%s4798_s0 + $0x328] sm:$0xff] }
  0x5f   :  { %256 = vrot.lane.b32.xlu0 %v2397_v31, %s3089_s27 }
  0x62   :  { %288 = vrot.lane.b32.xlu1 %v2405_v32, %s3090_s12 }
  0x63   :  { %512 = vrot.lane.b32.xlu0 %v2469_v33, %s3090_s12 }
  0x66   :  { %544 = vrot.lane.b32.xlu1 %v2477_v34, %s3091_s19 }
  0x67   :  { %418 = vrot.lane.b32.xlu0 %v2446_v35, %s3088_s18 }
  0x6a   :  { %320 = vrot.lane.b32.xlu1 %v2413_v36, %s3091_s19  ;;  %v2479_v36 = vld [vmem:[%s4798_s0 + $0x368] sm:$0xff] }
  0x6b   :  { %194 = vrot.lane.b32.xlu0 %v2382_v37, %s3088_s18  ;;  %v2448_v37 = vld [vmem:[%s4798_s0 + $0x270] sm:$0xff] }
  0x6e   :  { %576 = vrot.lane.b32.xlu1 %v2485_v38, %s3092_s23 }
  0x6f   :  { %450 = vrot.lane.b32.xlu0 %v2454_v39, %s3087_s17 }
  0x72   :  { %352 = vrot.lane.b32.xlu1 %v2421_v40, %s3092_s23  ;;  %v2415_v40 = vld [vmem:[%s4798_s0 + $0x168] sm:$0xff] }
  0x73   :  { %226 = vrot.lane.b32.xlu0 %v2390_v41, %s3087_s17  ;;  %v2384_v41 = vld [vmem:[%s4798_s0 + $0x70] sm:$0xff] }
  0x74   :  { %v443_v44 = vpop.permute.xlu1 %442 }
  0x75   :  { %v411_v45 = vpop.permute.xlu0 %410 }
  0x76   :  { %608 = vrot.lane.b32.xlu1 %v2493_v42, %s3093_s26  ;;  %v689_v7 = vsel %vm626_vm0, %v2434_v2, %v411_v45  ;;  %v2456_v45 = vld [vmem:[%s4798_s0 + $0x2b0] sm:$0xff] }
  0x77   :  { %482 = vrot.lane.b32.xlu0 %v2462_v43, %s3089_s27  ;;  %v697_v11 = vsel %vm635_vm1, %v689_v7, %v443_v44  ;;  %v2487_v44 = vld [vmem:[%s4798_s0 + $0x3a8] sm:$0xff]  ;;  %v2400_v2 = vld [vmem:[%s4798_s0 + $0xf0] sm:$0xff] }
  0x78   :  { %v219_v48 = vpop.permute.xlu1 %218 }
  0x79   :  { %v187_v49 = vpop.permute.xlu0 %186 }
  0x7a   :  { %384 = vrot.lane.b32.xlu1 %v2429_v46, %s3093_s26  ;;  %v627_v14 = vsel %vm626_vm0, %v35_v8, %v187_v49  ;;  %v2392_v49 = vld [vmem:[%s4798_s0 + $0xb0] sm:$0xff] }
  0x7b   :  { %258 = vrot.lane.b32.xlu0 %v2398_v47, %s3089_s27  ;;  %v636_v20 = vsel %vm635_vm1, %v627_v14, %v219_v48  ;;  %v2423_v48 = vld [vmem:[%s4798_s0 + $0x1a8] sm:$0xff] }
  0x7c   :  { %v251_v52 = vpop.permute.xlu1 %250 }
  0x7d   :  { %v475_v53 = vpop.permute.xlu0 %474  ;;  %v645_v24 = vsel %vm644_vm2, %v636_v20, %v251_v52 }
  0x7e   :  { %290 = vrot.lane.b32.xlu1 %v2406_v50, %s3090_s12  ;;  %v705_v15 = vsel %vm644_vm2, %v697_v11, %v475_v53  ;;  %v2435_v50 = vld [vmem:[%s4798_s0 + $0x208] sm:$0xff]  ;;  %v2408_v11 = vld [vmem:[%s4798_s0 + $0x130] sm:$0xff] }
  0x7f   :  { %514 = vrot.lane.b32.xlu0 %v2470_v51, %s3090_s12 }
  0x80   :  { %v283_v56 = vpop.permute.xlu1 %282 }
  0x81   :  { %v507_v57 = vpop.permute.xlu0 %506  ;;  %v654_v26 = vsel %vm653_vm3, %v645_v24, %v283_v56  ;;  %v36_v56 = vld [vmem:[%s4798_s0 + $0x8] sm:$0xff] }
  0x82   :  { %546 = vrot.lane.b32.xlu1 %v2478_v54, %s3091_s19  ;;  %v713_v16 = vsel %vm653_vm3, %v705_v15, %v507_v57  ;;  %v2495_v54 = vld [vmem:[%s4798_s0 + $0x3e8] sm:$0xff] }
  0x83   :  { %420 = vrot.lane.b32.xlu0 %v2447_v55, %s3088_s18  ;;  %v2464_v55 = vld [vmem:[%s4798_s0 + $0x2f0] sm:$0xff] }
  0x84   :  { %v539_v60 = vpop.permute.xlu1 %538 }
  0x85   :  { %v3519_v61 = vpop.permute.xlu0 %412  ;;  %v721_v17 = vsel %vm662_vm4, %v713_v16, %v539_v60 }
  0x86   :  { %322 = vrot.lane.b32.xlu1 %v2414_v58, %s3091_s19  ;;  %v690_v53 = vsel %vm626_vm0, %v2435_v50, %v3519_v61  ;;  %v2401_v50 = vld [vmem:[%s4798_s0 + $0xf8] sm:$0xff] }
  0x87   :  { %196 = vrot.lane.b32.xlu0 %v2383_v59, %s3088_s18 }
  0x88   :  { %v315_v0 = vpop.permute.xlu1 %314 }
  0x89   :  { %v3529_v1 = vpop.permute.xlu0 %188  ;;  %v663_v28 = vsel %vm662_vm4, %v654_v26, %v315_v0  ;;  %v2431_v0 = vld [vmem:[%s4798_s0 + $0x1e8] sm:$0xff] }
  0x8a   :  { %578 = vrot.lane.b32.xlu1 %v2486_v62, %s3092_s23  ;;  %v628_v62 = vsel %vm626_vm0, %v36_v56, %v3529_v1 }
  0x8b   :  { %452 = vrot.lane.b32.xlu0 %v2455_v63, %s3087_s17 }
  0x8c   :  { %v571_v5 = vpop.permute.xlu1 %570 }
  0x8d   :  { %v3542_v6 = vpop.permute.xlu0 %444  ;;  %v729_v21 = vsel %vm671_vm5, %v721_v17, %v571_v5 }
  0x8e   :  { %354 = vrot.lane.b32.xlu1 %v2422_v3, %s3092_s23  ;;  %v698_v57 = vsel %vm635_vm1, %v690_v53, %v3542_v6 }
  0x8f   :  { %228 = vrot.lane.b32.xlu0 %v2391_v4, %s3087_s17 }
  0x90   :  { %v347_v12 = vpop.permute.xlu1 %346 }
  0x91   :  { %v3557_v13 = vpop.permute.xlu0 %220  ;;  %v672_v31 = vsel %vm671_vm5, %v663_v28, %v347_v12  ;;  %v2472_v12 = vld [vmem:[%s4798_s0 + $0x330] sm:$0xff]  ;;  %v2457_v28 = vld [vmem:[%s4798_s0 + $0x2b8] sm:$0xff] }
  0x92   :  { %610 = vrot.lane.b32.xlu1 %v2494_v9, %s3093_s26  ;;  %v637_v3 = vsel %vm635_vm1, %v628_v62, %v3557_v13 }
  0x93   :  { %484 = vrot.lane.b32.xlu0 %v2463_v10, %s3089_s27 }
  0x94   :  { %v603_v22 = vpop.permute.xlu1 %602 }
  0x95   :  { %v477_v23 = vpop.permute.xlu0 %476  ;;  %v3575_v25 = vsel %vm680_vm6, %v729_v21, %v603_v22  ;;  %v2416_v22 = vld [vmem:[%s4798_s0 + $0x170] sm:$0xff] }
  0x96   :  { %386 = vrot.lane.b32.xlu1 %v2430_v18, %s3093_s26  ;;  %v883_v27 = vmul.f32 %v3575_v25, %v3575_v25  ;;  %841 = vmatprep.mubr.f32.mxu0 %v3575_v25  ;;  %v706_v60 = vsel %vm644_vm2, %v698_v57, %v477_v23  ;;  %v2480_v18 = vld [vmem:[%s4798_s0 + $0x370] sm:$0xff]  ;;  %v2385_v23 = vld [vmem:[%s4798_s0 + $0x78] sm:$0xff] }
  0x97   :  { %260 = vrot.lane.b32.xlu0 %v2399_v19, %s3089_s27  ;;  %v2449_v19 = vld [vmem:[%s4798_s0 + $0x278] sm:$0xff] }
  0x98   :  { %v379_v32 = vpop.permute.xlu1 %378  ;;  %962 = vmatprep.mubr.f32.mxu1 %v883_v27  ;;  %v2488_v27 = vld [vmem:[%s4798_s0 + $0x3b0] sm:$0xff] }
  0x99   :  { %v253_v33 = vpop.permute.xlu0 %252  ;;  %v3592_v34 = vsel %vm680_vm6, %v672_v31, %v379_v32  ;;  %v2424_v31 = vld [vmem:[%s4798_s0 + $0x1b0] sm:$0xff]  ;;  %v2393_v32 = vld [vmem:[%s4798_s0 + $0xb8] sm:$0xff] }
  0x9a   :  { %292 = vrot.lane.b32.xlu1 %v2407_v29, %s3090_s12  ;;  %v882_v35 = vmul.f32 %v3592_v34, %v3592_v34  ;;  %842 = vmatmul.mubr.f32.vlgmr.msra.gmra.mrb[0].mxu0 %v3592_v34  ;;  %v646_v7 = vsel %vm644_vm2, %v637_v3, %v253_v33  ;;  %v2436_v33 = vld [vmem:[%s4798_s0 + $0x210] sm:$0xff]  ;;  %v2417_v3 = vld [vmem:[%s4798_s0 + $0x178] sm:$0xff] }
  0x9b   :  { %516 = vrot.lane.b32.xlu0 %v2471_v30, %s3090_s12 }
  0x9c   :  { %v285_v38 = vpop.permute.xlu1 %284  ;;  %963 = vmatmul.mubr.f32.vlgmr.msra.gmra.mrb[0].mxu1 %v882_v35 }
  0x9d   :  { %v509_v39 = vpop.permute.xlu0 %508  ;;  %v655_v8 = vsel %vm653_vm3, %v646_v7, %v285_v38  ;;  %v2496_v38 = vld [vmem:[%s4798_s0 + $0x3f0] sm:$0xff]  ;;  %v2425_v7 = vld [vmem:[%s4798_s0 + $0x1b8] sm:$0xff] }
  0x9e   :  { %548 = vrot.lane.b32.xlu1 %v2479_v36, %s3091_s19  ;;  %v714_v61 = vsel %vm653_vm3, %v706_v60, %v509_v39  ;;  %v2465_v39 = vld [vmem:[%s4798_s0 + $0x2f8] sm:$0xff] }
  0x9f   :  { %422 = vrot.lane.b32.xlu0 %v2448_v37, %s3088_s18  ;;  %v2473_v60 = vld [vmem:[%s4798_s0 + $0x338] sm:$0xff] }
  0xa0   :  { %v541_v42 = vpop.permute.xlu1 %540 }
  0xa1   :  { %v3613_v43 = vpop.permute.xlu0 %414  ;;  %v722_v63 = vsel %vm662_vm4, %v714_v61, %v541_v42 }
  0xa2   :  { %324 = vrot.lane.b32.xlu1 %v2415_v40, %s3091_s19  ;;  %v691_v37 = vsel %vm626_vm0, %v2436_v33, %v3613_v43  ;;  %v37_v40 = vld [vmem:[%s4798_s0 + $0x10] sm:$0xff] }
  0xa3   :  { %198 = vrot.lane.b32.xlu0 %v2384_v41, %s3088_s18 }
  0xa4   :  { %v317_v46 = vpop.permute.xlu1 %316 }
  0xa5   :  { %v3623_v47 = vpop.permute.xlu0 %190  ;;  %v664_v10 = vsel %vm662_vm4, %v655_v8, %v317_v46  ;;  %v2489_v8 = vld [vmem:[%s4798_s0 + $0x3b8] sm:$0xff] }
  0xa6   :  { %580 = vrot.lane.b32.xlu1 %v2487_v44, %s3092_s23  ;;  %v629_v46 = vsel %vm626_vm0, %v37_v40, %v3623_v47 }
  0xa7   :  { %454 = vrot.lane.b32.xlu0 %v2456_v45, %s3087_s17 }
  0xa8   :  { %v573_v51 = vpop.permute.xlu1 %572 }
  0xa9   :  { %v3636_v52 = vpop.permute.xlu0 %446  ;;  %v730_v4 = vsel %vm671_vm5, %v722_v63, %v573_v51 }
  0xaa   :  { %356 = vrot.lane.b32.xlu1 %v2423_v48, %s3092_s23  ;;  %v699_v41 = vsel %vm635_vm1, %v691_v37, %v3636_v52 }
  0xab   :  { %230 = vrot.lane.b32.xlu0 %v2392_v49, %s3087_s17  ;;  %v2432_v49 = vld [vmem:[%s4798_s0 + $0x1f0] sm:$0xff] }
  0xac   :  { %v349_v58 = vpop.permute.xlu1 %348 }
  0xad   :  { %v3653_v59 = vpop.permute.xlu0 %222  ;;  %v673_v13 = vsel %vm671_vm5, %v664_v10, %v349_v58 }
  0xae   :  { %612 = vrot.lane.b32.xlu1 %v2495_v54, %s3093_s26  ;;  %v638_v51 = vsel %vm635_vm1, %v629_v46, %v3653_v59  ;;  %v2409_v59 = vld [vmem:[%s4798_s0 + $0x138] sm:$0xff] }
  0xaf   :  { %486 = vrot.lane.b32.xlu0 %v2464_v55, %s3089_s27 }
  0xb0   :  { %v605_v5 = vpop.permute.xlu1 %604 }
  0xb1   :  { %v479_v6 = vpop.permute.xlu0 %478  ;;  %v3673_v1 = vsel %vm680_vm6, %v730_v4, %v605_v5  ;;  %v2481_v4 = vld [vmem:[%s4798_s0 + $0x378] sm:$0xff] }
  0xb2   :  { %388 = vrot.lane.b32.xlu1 %v2431_v0, %s3093_s26  ;;  %v885_v9 = vmul.f32 %v3673_v1, %v3673_v1  ;;  %846 = vmatprep.mubr.f32.mxu0 %v3673_v1  ;;  %v707_v43 = vsel %vm644_vm2, %v699_v41, %v479_v6 }
  0xb3   :  { %262 = vrot.lane.b32.xlu0 %v2400_v2, %s3089_s27 }
  0xb4   :  { %v381_v14 = vpop.permute.xlu1 %380  ;;  %967 = vmatprep.mubr.f32.mxu1 %v885_v9 }
  0xb5   :  { %v255_v15 = vpop.permute.xlu0 %254  ;;  %v3690_v16 = vsel %vm680_vm6, %v673_v13, %v381_v14 }
  0xb6   :  { %294 = vrot.lane.b32.xlu1 %v2408_v11, %s3090_s12  ;;  %v884_v17 = vmul.f32 %v3690_v16, %v3690_v16  ;;  %847 = vmatmul.mubr.f32.gmra.mrb[2].mxu0 %v3690_v16  ;;  %v647_v55 = vsel %vm644_vm2, %v638_v51, %v255_v15  ;;  %v2433_v11 = vld [vmem:[%s4798_s0 + $0x1f8] sm:$0xff]  ;;  %v2438_v51 = vld [vmem:[%s4798_s0 + $0x220] sm:$0xff] }
  0xb7   :  { %518 = vrot.lane.b32.xlu0 %v2472_v12, %s3090_s12  ;;  %v2497_v12 = vld [vmem:[%s4798_s0 + $0x3f8] sm:$0xff] }
  0xb8   :  { %v287_v20 = vpop.permute.xlu1 %286  ;;  %968 = vmatmul.mubr.f32.gmra.mrb[2].mxu1 %v884_v17  ;;  %v2437_v15 = vld [vmem:[%s4798_s0 + $0x218] sm:$0xff] }
  0xb9   :  { %v511_v21 = vpop.permute.xlu0 %510  ;;  %v656_v56 = vsel %vm653_vm3, %v647_v55, %v287_v20  ;;  %v38_v20 = vld [vmem:[%s4798_s0 + $0x18] sm:$0xff]  ;;  %v39_v55 = vld [vmem:[%s4798_s0 + $0x20] sm:$0xff] }
  0xba   :  { %550 = vrot.lane.b32.xlu1 %v2480_v18, %s3091_s19  ;;  %v715_v45 = vsel %vm653_vm3, %v707_v43, %v511_v21 }
  0xbb   :  { %424 = vrot.lane.b32.xlu0 %v2449_v19, %s3088_s18 }
  0xbc   :  { %v543_v24 = vpop.permute.xlu1 %542 }
  0xbd   :  { %v3711_v26 = vpop.permute.xlu0 %416  ;;  %v723_v48 = vsel %vm662_vm4, %v715_v45, %v543_v24 }
  0xbe   :  { %326 = vrot.lane.b32.xlu1 %v2416_v22, %s3091_s19  ;;  %v692_v19 = vsel %vm626_vm0, %v2437_v15, %v3711_v26 }
  0xbf   :  { %200 = vrot.lane.b32.xlu0 %v2385_v23, %s3088_s18 }
  0xc0   :  { %v319_v29 = vpop.permute.xlu1 %318 }
  0xc1   :  { %v3721_v30 = vpop.permute.xlu0 %192  ;;  %v665_v58 = vsel %vm662_vm4, %v656_v56, %v319_v29 }
  0xc2   :  { %582 = vrot.lane.b32.xlu1 %v2488_v27, %s3092_s23 }
  0xc3   :  { %456 = vrot.lane.b32.xlu0 %v2457_v28, %s3087_s17  ;;  %v630_v28 = vsel %vm626_vm0, %v38_v20, %v3721_v30 }
  0xc4   :  { %v575_v35 = vpop.permute.xlu1 %574 }
  0xc5   :  { %v3734_v36 = vpop.permute.xlu0 %448  ;;  %v731_v52 = vsel %vm671_vm5, %v723_v48, %v575_v35 }
  0xc6   :  { %358 = vrot.lane.b32.xlu1 %v2424_v31, %s3092_s23  ;;  %v700_v21 = vsel %vm635_vm1, %v692_v19, %v3734_v36 }
  0xc7   :  { %232 = vrot.lane.b32.xlu0 %v2393_v32, %s3087_s17 }
  0xc8   :  { %v351_v42 = vpop.permute.xlu1 %350 }
  0xc9   :  { %v3751_v44 = vpop.permute.xlu0 %224  ;;  %v674_v61 = vsel %vm671_vm5, %v665_v58, %v351_v42 }
  0xca   :  { %614 = vrot.lane.b32.xlu1 %v2496_v38, %s3093_s26  ;;  %v639_v26 = vsel %vm635_vm1, %v630_v28, %v3751_v44  ;;  %v40_v28 = vld [vmem:[%s4798_s0 + $0x28] sm:$0xff] }
  0xcb   :  { %488 = vrot.lane.b32.xlu0 %v2465_v39, %s3089_s27 }
  0xcc   :  { %v607_v53 = vpop.permute.xlu1 %606 }
  0xcd   :  { %v481_v54 = vpop.permute.xlu0 %480  ;;  %v3771_v47 = vsel %vm680_vm6, %v731_v52, %v607_v53 }
  0xce   :  { %390 = vrot.lane.b32.xlu1 %v2432_v49, %s3093_s26  ;;  %v887_v57 = vmul.f32 %v3771_v47, %v3771_v47  ;;  %851 = vmatprep.mubr.f32.mxu0 %v3771_v47  ;;  %v708_v24 = vsel %vm644_vm2, %v700_v21, %v481_v54 }
  0xcf   :  { %264 = vrot.lane.b32.xlu0 %v2401_v50, %s3089_s27 }
  0xd0   :  { %v383_v62 = vpop.permute.xlu1 %382  ;;  %972 = vmatprep.mubr.f32.mxu1 %v887_v57 }
  0xd1   :  { %v257_v63 = vpop.permute.xlu0 %256  ;;  %v3788_v0 = vsel %vm680_vm6, %v674_v61, %v383_v62 }
  0xd2   :  { %296 = vrot.lane.b32.xlu1 %v2409_v59, %s3090_s12  ;;  %v886_v2 = vmul.f32 %v3788_v0, %v3788_v0  ;;  %852 = vmatmul.mubr.f32.gmra.mrb[4].mxu0 %v3788_v0  ;;  %v648_v35 = vsel %vm644_vm2, %v639_v26, %v257_v63 }
  0xd3   :  { %520 = vrot.lane.b32.xlu0 %v2473_v60, %s3090_s12 }
  0xd4   :  { %v289_v5 = vpop.permute.xlu1 %288  ;;  %973 = vmatmul.mubr.f32.gmra.mrb[4].mxu1 %v886_v2 }
  0xd5   :  { %v513_v6 = vpop.permute.xlu0 %512  ;;  %v657_v37 = vsel %vm653_vm3, %v648_v35, %v289_v5 }
  0xd6   :  { %328 = vrot.lane.b32.xlu1 %v2417_v3, %s3091_s19  ;;  %v716_v27 = vsel %vm653_vm3, %v708_v24, %v513_v6 }
  0xd7   :  { %552 = vrot.lane.b32.xlu0 %v2481_v4, %s3091_s19 }
  0xd8   :  { %v545_v9 = vpop.permute.xlu1 %544 }
  0xd9   :  { %v419_v10 = vpop.permute.xlu0 %418  ;;  %v724_v29 = vsel %vm662_vm4, %v716_v27, %v545_v9 }
  0xda   :  { %360 = vrot.lane.b32.xlu1 %v2425_v7, %s3092_s23  ;;  %v693_v54 = vsel %vm626_vm0, %v2438_v51, %v419_v10 }
  0xdb   :  { %584 = vrot.lane.b32.xlu0 %v2489_v8, %s3092_s23 }
  0xdc   :  { %v321_v13 = vpop.permute.xlu1 %320 }
  0xdd   :  { %v195_v14 = vpop.permute.xlu0 %194  ;;  %v666_v38 = vsel %vm662_vm4, %v657_v37, %v321_v13 }
  0xde   :  { %392 = vrot.lane.b32.xlu1 %v2433_v11, %s3093_s26  ;;  %v631_v61 = vsel %vm626_vm0, %v39_v55, %v195_v14 }
  0xdf   :  { %616 = vrot.lane.b32.xlu0 %v2497_v12, %s3093_s26 }
  0xe0   :  { %v577_v17 = vpop.permute.xlu1 %576 }
  0xe1   :  { %v451_v18 = vpop.permute.xlu0 %450  ;;  %v732_v31 = vsel %vm671_vm5, %v724_v29, %v577_v17 }
  0xe2   :  { %v701_v56 = vsel %vm635_vm1, %v693_v54, %v451_v18 }
  0xe4   :  { %v353_v22 = vpop.permute.xlu1 %352 }
  0xe5   :  { %v227_v23 = vpop.permute.xlu0 %226  ;;  %v675_v39 = vsel %vm671_vm5, %v666_v38, %v353_v22  ;;  %v2439_v22 = vld [vmem:[%s4798_s0 + $0x228] sm:$0xff] }
  0xe6   :  { %v640_v63 = vsel %vm635_vm1, %v631_v61, %v227_v23 }
  0xe8   :  { %v609_v32 = vpop.permute.xlu1 %608 }
  0xe9   :  { %v483_v33 = vpop.permute.xlu0 %482  ;;  %v3839_v36 = vsel %vm680_vm6, %v732_v31, %v609_v32 }
  0xea   :  { %856 = vmatprep.mubr.f32.mxu0 %v3839_v36  ;;  %v889_v30 = vmul.f32 %v3839_v36, %v3839_v36  ;;  %v709_v59 = vsel %vm644_vm2, %v701_v56, %v483_v33 }
  0xec   :  { %v385_v40 = vpop.permute.xlu1 %384  ;;  %977 = vmatprep.mubr.f32.mxu1 %v889_v30 }
  0xed   :  { %v259_v41 = vpop.permute.xlu0 %258  ;;  %v3848_v42 = vsel %vm680_vm6, %v675_v39, %v385_v40 }
  0xee   :  { %857 = vmatmul.mubr.f32.gmra.mrb[6].mxu0 %v3848_v42  ;;  %v888_v44 = vmul.f32 %v3848_v42, %v3848_v42  ;;  %v649_v5 = vsel %vm644_vm2, %v640_v63, %v259_v41  ;;  %v41_v63 = vld [vmem:[%s4798_s0 + $0x30] sm:$0xff] }
  0xf0   :  { %v291_v43 = vpop.permute.xlu1 %290  ;;  %978 = vmatmul.mubr.f32.gmra.mrb[6].mxu1 %v888_v44 }
  0xf1   :  { %v515_v45 = vpop.permute.xlu0 %514  ;;  %v658_v7 = vsel %vm653_vm3, %v649_v5, %v291_v43 }
  0xf2   :  { %v717_v60 = vsel %vm653_vm3, %v709_v59, %v515_v45  ;;  %v2440_v59 = vld [vmem:[%s4798_s0 + $0x230] sm:$0xff] }
  0xf4   :  { %v547_v46 = vpop.permute.xlu1 %546 }
  0xf5   :  { %v421_v48 = vpop.permute.xlu0 %420  ;;  %v725_v62 = vsel %vm662_vm4, %v717_v60, %v547_v46 }
  0xf6   :  { %v694_v27 = vsel %vm626_vm0, %v2439_v22, %v421_v48 }
  0xf8   :  { %v323_v49 = vpop.permute.xlu1 %322 }
  0xf9   :  { %v197_v50 = vpop.permute.xlu0 %196  ;;  %v667_v9 = vsel %vm662_vm4, %v658_v7, %v323_v49 }
  0xfa   :  { %v632_v35 = vsel %vm626_vm0, %v40_v28, %v197_v50 }
  0xfc   :  { %v579_v52 = vpop.permute.xlu1 %578 }
  0xfd   :  { %v453_v53 = vpop.permute.xlu0 %452  ;;  %v733_v2 = vsel %vm671_vm5, %v725_v62, %v579_v52 }
  0xfe   :  { %v702_v29 = vsel %vm635_vm1, %v694_v27, %v453_v53 }
 0x100   :  { %v355_v57 = vpop.permute.xlu1 %354 }
 0x101   :  { %v229_v58 = vpop.permute.xlu0 %228  ;;  %v676_v10 = vsel %vm671_vm5, %v667_v9, %v355_v57 }
 0x102   :  { %v641_v30 = vsel %vm635_vm1, %v632_v35, %v229_v58 }
 0x104   :  { %v611_v3 = vpop.permute.xlu1 %610 }
 0x105   :  { %v485_v4 = vpop.permute.xlu0 %484  ;;  %v3869_v6 = vsel %vm680_vm6, %v733_v2, %v611_v3 }
 0x106   :  { %861 = vmatprep.mubr.f32.mxu0 %v3869_v6  ;;  %v891_v8 = vmul.f32 %v3869_v6, %v3869_v6  ;;  %v710_v32 = vsel %vm644_vm2, %v702_v29, %v485_v4 }
 0x108   :  { %v387_v11 = vpop.permute.xlu1 %386  ;;  %982 = vmatprep.mubr.f32.mxu1 %v891_v8 }
 0x109   :  { %v261_v12 = vpop.permute.xlu0 %260  ;;  %v3878_v13 = vsel %vm680_vm6, %v676_v10, %v387_v11 }
 0x10a   :  { %862 = vmatmul.mubr.f32.gmra.mrb[8].mxu0 %v3878_v13  ;;  %v890_v14 = vmul.f32 %v3878_v13, %v3878_v13  ;;  %v650_v41 = vsel %vm644_vm2, %v641_v30, %v261_v12 }
 0x10c   :  { %v293_v15 = vpop.permute.xlu1 %292  ;;  %983 = vmatmul.mubr.f32.gmra.mrb[8].mxu1 %v890_v14 }
 0x10d   :  { %v517_v17 = vpop.permute.xlu0 %516  ;;  %v659_v43 = vsel %vm653_vm3, %v650_v41, %v293_v15 }
 0x10e   :  { %v718_v33 = vsel %vm653_vm3, %v710_v32, %v517_v17 }
 0x110   :  { %v549_v18 = vpop.permute.xlu1 %548 }
 0x111   :  { %v423_v19 = vpop.permute.xlu0 %422  ;;  %v726_v37 = vsel %vm662_vm4, %v718_v33, %v549_v18 }
 0x112   :  { %v695_v62 = vsel %vm626_vm0, %v2440_v59, %v423_v19 }
 0x114   :  { %v325_v20 = vpop.permute.xlu1 %324 }
 0x115   :  { %v199_v21 = vpop.permute.xlu0 %198  ;;  %v668_v46 = vsel %vm662_vm4, %v659_v43, %v325_v20 }
 0x116   :  { %v633_v8 = vsel %vm626_vm0, %v41_v63, %v199_v21 }
 0x118   :  { %v581_v23 = vpop.permute.xlu1 %580 }
 0x119   :  { %v455_v24 = vpop.permute.xlu0 %454  ;;  %v734_v38 = vsel %vm671_vm5, %v726_v37, %v581_v23 }
 0x11a   :  { %v703_v2 = vsel %vm635_vm1, %v695_v62, %v455_v24 }
 0x11c   :  { %v357_v26 = vpop.permute.xlu1 %356 }
 0x11d   :  { %v231_v31 = vpop.permute.xlu0 %230  ;;  %v677_v48 = vsel %vm671_vm5, %v668_v46, %v357_v26  ;;  %v2441_v26 = vld [vmem:[%s4798_s0 + $0x238] sm:$0xff] }
 0x11e   :  { %v642_v10 = vsel %vm635_vm1, %v633_v8, %v231_v31  ;;  %v42_v31 = vld [vmem:[%s4798_s0 + $0x38] sm:$0xff] }
 0x120   :  { %v613_v39 = vpop.permute.xlu1 %612 }
 0x121   :  { %v487_v40 = vpop.permute.xlu0 %486  ;;  %v3899_v44 = vsel %vm680_vm6, %v734_v38, %v613_v39 }
 0x122   :  { %866 = vmatprep.mubr.f32.mxu0 %v3899_v44  ;;  %v893_v45 = vmul.f32 %v3899_v44, %v3899_v44  ;;  %v711_v5 = vsel %vm644_vm2, %v703_v2, %v487_v40 }
 0x124   :  { %v389_v49 = vpop.permute.xlu1 %388  ;;  %987 = vmatprep.mubr.f32.mxu1 %v893_v45 }
 0x125   :  { %v263_v50 = vpop.permute.xlu0 %262  ;;  %v3908_v51 = vsel %vm680_vm6, %v677_v48, %v389_v49 }
 0x126   :  { %867 = vmatmul.mubr.f32.gmra.mrb[10].mxu0 %v3908_v51  ;;  %v892_v52 = vmul.f32 %v3908_v51, %v3908_v51  ;;  %v651_v15 = vsel %vm644_vm2, %v642_v10, %v263_v50 }
 0x128   :  { %v295_v53 = vpop.permute.xlu1 %294  ;;  %988 = vmatmul.mubr.f32.gmra.mrb[10].mxu1 %v892_v52 }
 0x129   :  { %v519_v54 = vpop.permute.xlu0 %518  ;;  %v660_v18 = vsel %vm653_vm3, %v651_v15, %v295_v53 }
 0x12a   :  { %v719_v7 = vsel %vm653_vm3, %v711_v5, %v519_v54 }
 0x12c   :  { %v551_v55 = vpop.permute.xlu1 %550 }
 0x12d   :  { %v425_v56 = vpop.permute.xlu0 %424  ;;  %v727_v9 = vsel %vm662_vm4, %v719_v7, %v551_v55 }
 0x12e   :  { %v696_v35 = vsel %vm626_vm0, %v2441_v26, %v425_v56 }
 0x130   :  { %v327_v57 = vpop.permute.xlu1 %326 }
 0x131   :  { %v201_v58 = vpop.permute.xlu0 %200  ;;  %v669_v20 = vsel %vm662_vm4, %v660_v18, %v327_v57 }
 0x132   :  { %v634_v37 = vsel %vm626_vm0, %v42_v31, %v201_v58 }
 0x134   :  { %v583_v60 = vpop.permute.xlu1 %582 }
 0x135   :  { %v457_v61 = vpop.permute.xlu0 %456  ;;  %v735_v11 = vsel %vm671_vm5, %v727_v9, %v583_v60 }
 0x136   :  { %v704_v30 = vsel %vm635_vm1, %v696_v35, %v457_v61 }
 0x138   :  { %v359_v3 = vpop.permute.xlu1 %358 }
 0x139   :  { %v233_v4 = vpop.permute.xlu0 %232  ;;  %v678_v21 = vsel %vm671_vm5, %v669_v20, %v359_v3 }
 0x13a   :  { %v643_v38 = vsel %vm635_vm1, %v634_v37, %v233_v4 }
 0x13c   :  { %v615_v12 = vpop.permute.xlu1 %614 }
 0x13d   :  { %v489_v14 = vpop.permute.xlu0 %488  ;;  %v3929_v17 = vsel %vm680_vm6, %v735_v11, %v615_v12 }
 0x13e   :  { %871 = vmatprep.mubr.f32.mxu0 %v3929_v17  ;;  %v895_v19 = vmul.f32 %v3929_v17, %v3929_v17  ;;  %v712_v41 = vsel %vm644_vm2, %v704_v30, %v489_v14 }
 0x140   :  { %v391_v22 = vpop.permute.xlu1 %390  ;;  %992 = vmatprep.mubr.f32.mxu1 %v895_v19 }
 0x141   :  { %v265_v23 = vpop.permute.xlu0 %264  ;;  %v3938_v24 = vsel %vm680_vm6, %v678_v21, %v391_v22 }
 0x142   :  { %872 = vmatmul.mubr.f32.gmra.mrb[12].mxu0 %v3938_v24  ;;  %v894_v27 = vmul.f32 %v3938_v24, %v3938_v24  ;;  %v652_v43 = vsel %vm644_vm2, %v643_v38, %v265_v23 }
 0x144   :  { %v297_v28 = vpop.permute.xlu1 %296  ;;  %993 = vmatmul.mubr.f32.gmra.mrb[12].mxu1 %v894_v27 }
 0x145   :  { %v521_v29 = vpop.permute.xlu0 %520  ;;  %v661_v45 = vsel %vm653_vm3, %v652_v43, %v297_v28 }
 0x146   :  { %v720_v46 = vsel %vm653_vm3, %v712_v41, %v521_v29 }
 0x148   :  { %v329_v32 = vpop.permute.xlu1 %328 }
 0x149   :  { %v553_v33 = vpop.permute.xlu0 %552  ;;  %v670_v48 = vsel %vm662_vm4, %v661_v45, %v329_v32 }
 0x14a   :  { %v728_v49 = vsel %vm662_vm4, %v720_v46, %v553_v33 }
 0x14c   :  { %v361_v39 = vpop.permute.xlu1 %360 }
 0x14d   :  { %v585_v40 = vpop.permute.xlu0 %584  ;;  %v679_v50 = vsel %vm671_vm5, %v670_v48, %v361_v39 }
 0x14e   :  { %v736_v52 = vsel %vm671_vm5, %v728_v49, %v585_v40 }
 0x150   :  { %v393_v53 = vpop.permute.xlu1 %392 }
 0x151   :  { %v617_v54 = vpop.permute.xlu0 %616  ;;  %v3965_v56 = vsel %vm680_vm6, %v679_v50, %v393_v53 }
 0x152   :  { %v3962_v55 = vsel %vm680_vm6, %v736_v52, %v617_v54  ;;  %v896_v58 = vmul.f32 %v3965_v56, %v3965_v56 }
 0x153   :  { %876 = vmatprep.mubr.f32.mxu0 %v3962_v55  ;;  %v897_v57 = vmul.f32 %v3962_v55, %v3962_v55 }
 0x154   :  { %877 = vmatmul.mubr.f32.gmra.mrb[14].mxu0 %v3965_v56 }
 0x155   :  { %997 = vmatprep.mubr.f32.mxu1 %v897_v57 }
 0x156   :  { %998 = vmatmul.mubr.f32.gmra.mrb[14].mxu1 %v896_v58 }
 0x16d   :  { %v2646_v59 = vpop.f32.mrb[0].mxu0 }
 0x16e   :  { %v2647_v60 = vpop.f32.mrb[1].mxu0 }
 0x16f   :  { %v2702_v61 = vpop.f32.mrb[0].mxu1  ;;  %v2648_v62 = vadd.f32 %v2647_v60, %v2646_v59 }
 0x170   :  { %v2703_v63 = vpop.f32.mrb[1].mxu1 }
 0x171   :  { %v2704_v2 = vadd.f32 %v2703_v63, %v2702_v61 }
 0x189   :  { %v2649_v3 = vpop.f32.mrb[2].mxu0 }
 0x18a   :  { %v2650_v4 = vpop.f32.mrb[3].mxu0 }
 0x18b   :  { %v2705_v5 = vpop.f32.mrb[2].mxu1  ;;  %v2651_v7 = vadd.f32 %v2650_v4, %v2649_v3 }
 0x18c   :  { %v2706_v8 = vpop.f32.mrb[3].mxu1 }
 0x18d   :  { %v2707_v9 = vadd.f32 %v2706_v8, %v2705_v5  ;;  %v1043_v5 = vld [vmem:[%s4800_s3] sm:$0xff] }
 0x18e   :  { %2778 = vmatprep.mubr.msk.f32.mxu0 %vm653_vm3, %v1043_v5 }
 0x18f   :  { %v2983_v10 = vpack.i.bf16 %v2707_v9, %v2704_v2 }
 0x191   :  { %2984 = vrot.lane.b32.xlu0 %v2983_v10, %s3088_s18 }
 0x1a5   :  { %v2652_v11 = vpop.f32.mrb[4].mxu0 }
 0x1a6   :  { %v2653_v12 = vpop.f32.mrb[5].mxu0 }
 0x1a7   :  { %v2708_v14 = vpop.f32.mrb[4].mxu1  ;;  %v2654_v15 = vadd.f32 %v2653_v12, %v2652_v11 }
 0x1a8   :  { %v2709_v18 = vpop.f32.mrb[5].mxu1 }
 0x1a9   :  { %v2710_v19 = vadd.f32 %v2709_v18, %v2708_v14 }
 0x1c1   :  { %v2655_v20 = vpop.f32.mrb[6].mxu0 }
 0x1c2   :  { %v2656_v21 = vpop.f32.mrb[7].mxu0 }
 0x1c3   :  { %v2657_v22 = vadd.f32 %v2656_v21, %v2655_v20  ;;  %v2711_v23 = vpop.f32.mrb[6].mxu1 }
 0x1c4   :  { %v2712_v27 = vpop.f32.mrb[7].mxu1 }
 0x1c5   :  { %v2713_v28 = vadd.f32 %v2712_v27, %v2711_v23 }
 0x1c7   :  { %v2988_v29 = vpack.i.bf16 %v2713_v28, %v2710_v19 }
 0x1c9   :  { %2989 = vrot.lane.b32.xlu1 %v2988_v29, %s3088_s18 }
 0x1dd   :  { %v2658_v26 = vpop.f32.mrb[8].mxu0 }
 0x1de   :  { %v2659_v31 = vpop.f32.mrb[9].mxu0 }
 0x1df   :  { %v2660_v32 = vadd.f32 %v2659_v31, %v2658_v26  ;;  %v2714_v33 = vpop.f32.mrb[8].mxu1 }
 0x1e0   :  { %v2715_v35 = vpop.f32.mrb[9].mxu1 }
 0x1e1   :  { %v2716_v37 = vadd.f32 %v2715_v35, %v2714_v33  ;;  %v1044_v35 = vld [vmem:[%s4800_s3 + $0x8] sm:$0xff] }
 0x1f9   :  { %v2661_v30 = vpop.f32.mrb[10].mxu0 }
 0x1fa   :  { %v2662_v38 = vpop.f32.mrb[11].mxu0 }
 0x1fb   :  { %v2663_v39 = vadd.f32 %v2662_v38, %v2661_v30  ;;  %v2717_v40 = vpop.f32.mrb[10].mxu1 }
 0x1fc   :  { %v2718_v41 = vpop.f32.mrb[11].mxu1 }
 0x1fd   :  { %v2719_v43 = vadd.f32 %v2718_v41, %v2717_v40 }
 0x1ff   :  { %v2993_v45 = vpack.i.bf16 %v2719_v43, %v2716_v37  ;;  %v1046_v37 = vld [vmem:[%s4800_s3 + $0x18] sm:$0xff] }
 0x201   :  { %2994 = vrot.lane.b32.xlu0 %v2993_v45, %s3088_s18 }
 0x203   :  { %v2985_v46 = vpop.permute.xlu0 %2984 }
 0x204   :  { %v2987_v48 = vunpack.i.h.bf16 %v2985_v46  ;;  %v2986_v49 = vunpack.i.l.bf16 %v2985_v46 }
 0x206   :  { %v1035_v50 = vsel %vm626_vm0, %v2648_v62, %v2986_v49  ;;  %v1036_v52 = vsel %vm626_vm0, %v2651_v7, %v2987_v48 }
 0x207   :  { %v2888_v53 = vpack.c.bf16 %v1036_v52, %v1035_v50 }
 0x209   :  { %2889 = vmatprep.subr.bf16.mxu0 %v2888_v53 }
 0x20a   :  { %2891 = vmatpush3.bf16.msra.mxu0 %v2888_v53 }
 0x215   :  { %v2664_v54 = vpop.f32.mrb[12].mxu0 }
 0x216   :  { %v2665_v57 = vpop.f32.mrb[13].mxu0 }
 0x217   :  { %v2666_v58 = vadd.f32 %v2665_v57, %v2664_v54  ;;  %v2720_v59 = vpop.f32.mrb[12].mxu1 }
 0x218   :  { %v2721_v60 = vpop.f32.mrb[13].mxu1 }
 0x219   :  { %v2722_v61 = vadd.f32 %v2721_v60, %v2720_v59 }
 0x227   :  { %v2667_v63 = vpop.f32.mrb[14].mxu0 }
 0x228   :  { %v2668_v2 = vpop.f32.mrb[15].mxu0 }
 0x229   :  { %v2669_v3 = vadd.f32 %v2668_v2, %v2667_v63  ;;  %v2723_v4 = vpop.f32.mrb[14].mxu1 }
 0x22a   :  { %v2724_v62 = vpop.f32.mrb[15].mxu1 }
 0x22b   :  { %v2725_v7 = vadd.f32 %v2724_v62, %v2723_v4 }
 0x22d   :  { %v2998_v8 = vpack.i.bf16 %v2725_v7, %v2722_v61 }
 0x22f   :  { %2999 = vrot.lane.b32.xlu1 %v2998_v8, %s3088_s18 }
 0x23b   :  { %v2990_v9 = vpop.permute.xlu1 %2989 }
 0x23c   :  { %v2992_v10 = vunpack.i.h.bf16 %v2990_v9  ;;  %v2991_v11 = vunpack.i.l.bf16 %v2990_v9 }
 0x23e   :  { %v1037_v12 = vsel %vm626_vm0, %v2654_v15, %v2991_v11  ;;  %v1038_v14 = vsel %vm626_vm0, %v2657_v22, %v2992_v10 }
 0x23f   :  { %v2892_v18 = vpack.c.bf16 %v1038_v14, %v1037_v12 }
 0x241   :  { %2893 = vmatprep.subr.bf16.mxu0 %v2892_v18 }
 0x242   :  { %2895 = vmatpush3.bf16.msra.mxu0 %v2892_v18  ;;  %v1200_v18 = vld [vmem:[%s4801_s4] sm:$0xff] }
 0x243   :  { %2800 = vmatprep.mubr.msk.f32.mxu1 %vm653_vm3, %v1200_v18 }
 0x273   :  { %v2995_v19 = vpop.permute.xlu0 %2994 }
 0x274   :  { %v2997_v20 = vunpack.i.h.bf16 %v2995_v19  ;;  %v2996_v21 = vunpack.i.l.bf16 %v2995_v19 }
 0x276   :  { %v1039_v23 = vsel %vm626_vm0, %v2660_v32, %v2996_v21  ;;  %v1040_v27 = vsel %vm626_vm0, %v2663_v39, %v2997_v20  ;;  %v1045_v32 = vld [vmem:[%s4800_s3 + $0x10] sm:$0xff] }
 0x277   :  { %v2896_v28 = vpack.c.bf16 %v1040_v27, %v1039_v23  ;;  %v1410_v27 = vld [vmem:[%s4802_s2 + $0x8] sm:$0xff] }
 0x279   :  { %2897 = vmatprep.subr.bf16.mxu0 %v2896_v28 }
 0x27a   :  { %2899 = vmatpush3.bf16.msra.mxu0 %v2896_v28  ;;  %v1412_v28 = vld [vmem:[%s4802_s2 + $0x18] sm:$0xff] }
 0x2a1   :  { %v3000_v29 = vpop.permute.xlu1 %2999 }
 0x2a2   :  { %v3002_v26 = vunpack.i.h.bf16 %v3000_v29  ;;  %v3001_v31 = vunpack.i.l.bf16 %v3000_v29  ;;  %v1409_v29 = vld [vmem:[%s4802_s2] sm:$0xff] }
 0x2a4   :  { %v1041_v15 = vsel %vm626_vm0, %v2666_v58, %v3001_v31  ;;  %v1042_v22 = vsel %vm626_vm0, %v2669_v3, %v3002_v26  ;;  %v2920_v26 = vpack.c.bf16 %v1412_v28, %v1410_v27  ;;  %v1411_v31 = vld [vmem:[%s4802_s2 + $0x10] sm:$0xff] }
 0x2a5   :  { %v2900_v33 = vpack.c.bf16 %v1042_v22, %v1041_v15  ;;  %v2922_v15 = vpack.c.bf16 %v1411_v31, %v1409_v29 }
 0x2a7   :  { %2901 = vmatprep.subr.bf16.mxu0 %v2900_v33 }
 0x2a8   :  { %2903 = vmatpush3.bf16.msra.mxu0 %v2900_v33 }
 0x2a9   :  { %2921 = vmatprep.subr.bf16.mxu0 %v2920_v26 }
 0x2ab   :  { %2779 = vmatmul.mubr.msk.f32.vlgmr.msra.gmra.mrb[16].mxu0 %vm653_vm3, %v1044_v35 }
 0x2ac   :  { %2781 = vmatprep.mubr.msk.f32.mxu0 %vm653_vm3, %v1045_v32  ;;  %2923 = vmatpush1.bf16.msra.mxu0 %v2922_v15 }
 0x2af   :  { %2782 = vmatmul.mubr.msk.f32.gmra.mrb[18].mxu0 %vm653_vm3, %v1046_v37 }
 0x37e   :  { %v2780_v30 = vpop.f32.mrb[16].mxu0 }
 0x37f   :  { %v1145_v38 = vmul.f32 0.03125, %v2780_v30  ;;  %v1125_v39 = vpop.f32.mrb[17].mxu0 }
 0x380   :  { %v1144_v40 = vmul.f32 0.03125, %v1125_v39 }
 0x381   :  { %v1149_v41 = vmul.f32 %v1145_v38, %v1145_v38 }
 0x382   :  { %v1148_v43 = vmul.f32 %v1144_v40, %v1144_v40  ;;  %v2783_v45 = vpop.f32.mrb[18].mxu0  ;;  %v2904_v46 = vpack.c.bf16 %v1145_v38, %v1144_v40 }
 0x383   :  { %v1147_v48 = vmul.f32 0.03125, %v2783_v45  ;;  %1158 = vrot.lane.b32.xlu1 %v1149_v41, %s3088_s18  ;;  %v1135_v49 = vpop.f32.mrb[19].mxu0  ;;  %v1202_v41 = vld [vmem:[%s4801_s4 + $0x10] sm:$0xff]  ;;  %v1204_v45 = vld [vmem:[%s4801_s4 + $0x20] sm:$0xff] }
 0x384   :  { %v1146_v50 = vmul.f32 0.03125, %v1135_v49  ;;  %2905 = vmatprep.subr.bf16.mxu1 %v2904_v46  ;;  %1156 = vrot.lane.b32.xlu0 %v1148_v43, %s3088_s18  ;;  %v1203_v43 = vld [vmem:[%s4801_s4 + $0x18] sm:$0xff] }
 0x385   :  { %v1151_v52 = vmul.f32 %v1147_v48, %v1147_v48  ;;  %2907 = vmatpush3.bf16.msra.mxu1 %v2904_v46  ;;  %v1205_v46 = vld [vmem:[%s4801_s4 + $0x28] sm:$0xff]  ;;  %v1207_v49 = vld [vmem:[%s4801_s4 + $0x38] sm:$0xff] }
 0x386   :  { %v1150_v53 = vmul.f32 %v1146_v50, %v1146_v50  ;;  %v2908_v54 = vpack.c.bf16 %v1147_v48, %v1146_v50 }
 0x387   :  { %1162 = vrot.lane.b32.xlu1 %v1151_v52, %s3088_s18  ;;  %v1209_v52 = vld [vmem:[%s4801_s4 + $0x48] sm:$0xff] }
 0x388   :  { %1160 = vrot.lane.b32.xlu0 %v1150_v53, %s3088_s18  ;;  %2909 = vmatprep.subr.bf16.mxu1 %v2908_v54  ;;  %v1210_v53 = vld [vmem:[%s4801_s4 + $0x50] sm:$0xff] }
 0x389   :  { %2911 = vmatpush3.bf16.msra.mxu1 %v2908_v54  ;;  %v1211_v54 = vld [vmem:[%s4801_s4 + $0x58] sm:$0xff] }
 0x3f5   :  { %v1159_v57 = vpop.permute.xlu1 %1158 }
 0x3f6   :  { %v1169_v58 = vsub.f32 %v1145_v38, %v1159_v57  ;;  %v1157_v59 = vpop.permute.xlu0 %1156  ;;  %v1212_v57 = vld [vmem:[%s4801_s4 + $0x60] sm:$0xff] }
 0x3f7   :  { %v1168_v60 = vsub.f32 %v1144_v40, %v1157_v59  ;;  %v1201_v40 = vld [vmem:[%s4801_s4 + $0x8] sm:$0xff]  ;;  %v1214_v59 = vld [vmem:[%s4801_s4 + $0x70] sm:$0xff] }
 0x3f8   :  { %v1173_v61 = vmax.f32 %v1169_v58, 0.0  ;;  %v1213_v58 = vld [vmem:[%s4801_s4 + $0x68] sm:$0xff] }
 0x3f9   :  { %v1172_v63 = vmax.f32 %v1168_v60, 0.0  ;;  %v1163_v2 = vpop.permute.xlu1 %1162  ;;  %v1215_v60 = vld [vmem:[%s4801_s4 + $0x78] sm:$0xff] }
 0x3fa   :  { %v1177_v3 = vadd.f32 1e-05, %v1173_v61  ;;  %v1171_v4 = vsub.f32 %v1147_v48, %v1163_v2  ;;  %v1161_v5 = vpop.permute.xlu0 %1160  ;;  %v1206_v48 = vld [vmem:[%s4801_s4 + $0x30] sm:$0xff]  ;;  %v3094_v61 = vmov 0.0   ;;  %v1654_v2 = vld [vmem:[%s4803_s5] sm:$0xff] }
 0x3fb   :  { %v1176_v62 = vadd.f32 1e-05, %v1172_v63  ;;  %v1170_v7 = vsub.f32 %v1146_v50, %v1161_v5  ;;  %v1208_v50 = vld [vmem:[%s4801_s4 + $0x40] sm:$0xff]  ;;  %1525 = vmatprep.mubr.f32.mxu0 %v3094_v61  ;;  %v3095_v63 = vmov 0   ;;  %v1656_v5 = vld [vmem:[%s4803_s5 + $0x10] sm:$0xff] }
 0x3fc   :  { %3015 = vrsqrt.f32 %v1177_v3  ;;  %v1175_v8 = vmax.f32 %v1171_v4, 0.0  ;;  %3013 = vset.pattern.permute.xlu0 %v3095_v63  ;;  %3014 = vset.pattern.permute.xlu1 %v3095_v63  ;;  %v1655_v3 = vld [vmem:[%s4803_s5 + $0x8] sm:$0xff]  ;;  %v1657_v4 = vld [vmem:[%s4803_s5 + $0x18] sm:$0xff] }
 0x3fd   :  { %3017 = vrsqrt.f32 %v1176_v62  ;;  %v1174_v9 = vmax.f32 %v1170_v7, 0.0  ;;  %v1659_v62 = vld [vmem:[%s4803_s5 + $0x28] sm:$0xff]  ;;  %v1658_v7 = vld [vmem:[%s4803_s5 + $0x20] sm:$0xff] }
 0x3fe   :  { %v1179_v10 = vadd.f32 1e-05, %v1175_v8  ;;  %v1661_v8 = vld [vmem:[%s4803_s5 + $0x38] sm:$0xff] }
 0x3ff   :  { %v1178_v11 = vadd.f32 1e-05, %v1174_v9  ;;  %v1660_v9 = vld [vmem:[%s4803_s5 + $0x30] sm:$0xff]  ;;  %s3096_s5 = smov 1  }
 0x400   :  { %3019 = vrsqrt.f32 %v1179_v10 }
 0x401   :  { %3021 = vrsqrt.f32 %v1178_v11 }
 0x406   :  { %v3016_v12 = vpop.eup %3015 }
 0x407   :  { %v3018_v14 = vpop.eup %3017 }
 0x408   :  { %v3003_v19 = vpack.i.bf16 %v3016_v12, %v3018_v14 }
 0x40a   :  { %v3020_v20 = vpop.eup %3019  ;;  %3004 = vrot.lane.b32.xlu0 %v3003_v19, %s3093_s26 }
 0x40b   :  { %v3022_v21 = vpop.eup %3021 }
 0x40c   :  { %v3008_v23 = vpack.i.bf16 %v3020_v20, %v3022_v21 }
 0x40e   :  { %3009 = vrot.lane.b32.xlu1 %v3008_v23, %s3093_s26  ;;  %1664 = vperm.xlu0 %3013, %v1654_v2  }
 0x412   :  { %1669 = vperm.xlu1 %3014, %v1655_v3   ;;  %1679 = vperm.xlu0 %3013, %v1657_v4  }
 0x416   :  { %1674 = vperm.xlu1 %3014, %v1656_v5   ;;  %1689 = vperm.xlu0 %3013, %v1659_v62  }
 0x41a   :  { %1684 = vperm.xlu1 %3014, %v1658_v7   ;;  %1699 = vperm.xlu0 %3013, %v1661_v8  }
 0x41e   :  { %1694 = vperm.xlu1 %3014, %v1660_v9  }
 0x47c   :  { %v3005_v22 = vpop.permute.xlu0 %3004 }
 0x47d   :  { %v3007_v33 = vunpack.i.h.bf16 %v3005_v22  ;;  %v3006_v35 = vunpack.i.l.bf16 %v3005_v22 }
 0x47f   :  { %v2912_v32 = vpack.c.bf16 %v3007_v33, %v3006_v35 }
 0x480   :  { %v3010_v37 = vpop.permute.xlu1 %3009 }
 0x481   :  { %v3012_v30 = vunpack.i.h.bf16 %v3010_v37  ;;  %v3011_v38 = vunpack.i.l.bf16 %v3010_v37  ;;  %2913 = vmatprep.subr.bf16.mxu1 %v2912_v32 }
 0x482   :  { %2915 = vmatpush3.bf16.msra.mxu1 %v2912_v32 }
 0x483   :  { %v2916_v39 = vpack.c.bf16 %v3012_v30, %v3011_v38 }
 0x485   :  { %2917 = vmatprep.subr.bf16.mxu1 %v2916_v39 }
 0x486   :  { %2919 = vmatpush3.bf16.msra.mxu1 %v2916_v39 }
 0x489   :  { %2801 = vmatmul.mubr.msk.f32.vlgmr.msra.gmra.mrb[16].mxu1 %vm653_vm3, %v1201_v40 }
 0x48a   :  { %2803 = vmatprep.mubr.msk.f32.mxu1 %vm653_vm3, %v1202_v41 }
 0x48d   :  { %2804 = vmatmul.mubr.msk.f32.gmra.mrb[18].mxu1 %vm653_vm3, %v1203_v43 }
 0x48e   :  { %2806 = vmatprep.mubr.msk.f32.mxu1 %vm653_vm3, %v1204_v45 }
 0x491   :  { %2807 = vmatmul.mubr.msk.f32.gmra.mrb[20].mxu1 %vm653_vm3, %v1205_v46  ;;  %v1670_v5 = vpop.permute.xlu1 %1669 }
 0x492   :  { %2809 = vmatprep.mubr.msk.f32.mxu1 %vm653_vm3, %v1206_v48 }
 0x495   :  { %2810 = vmatmul.mubr.msk.f32.gmra.mrb[22].mxu1 %vm653_vm3, %v1207_v49 }
 0x496   :  { %2812 = vmatprep.mubr.msk.f32.mxu1 %vm653_vm3, %v1208_v50 }
 0x499   :  { %2813 = vmatmul.mubr.msk.f32.gmra.mrb[24].mxu1 %vm653_vm3, %v1209_v52 }
 0x49a   :  { %2815 = vmatprep.mubr.msk.f32.mxu1 %vm653_vm3, %v1210_v53 }
 0x49d   :  { %2816 = vmatmul.mubr.msk.f32.gmra.mrb[26].mxu1 %vm653_vm3, %v1211_v54 }
 0x49e   :  { %2818 = vmatprep.mubr.msk.f32.mxu1 %vm653_vm3, %v1212_v57 }
 0x4a1   :  { %2819 = vmatmul.mubr.msk.f32.gmra.mrb[28].mxu1 %vm653_vm3, %v1213_v58 }
 0x4a2   :  { %2821 = vmatprep.mubr.msk.f32.mxu1 %vm653_vm3, %v1214_v59 }
 0x4a5   :  { %2822 = vmatmul.mubr.msk.f32.gmra.mrb[30].mxu1 %vm653_vm3, %v1215_v60 }
 0x55c   :  { %v2802_v10 = vpop.f32.mrb[16].mxu1 }
 0x55d   :  { %v1330_v11 = vpop.f32.mrb[17].mxu1 }
 0x55e   :  { %2518 = vmatmul.mubr.msk.f32.vlgmr.msra.gmra.mrb[20].mxu0 %vm626_vm0, %v1330_v11 }
 0x55f   :  { %1531 = vmatprep.mubr.f32.mxu0 %v3094_v61 }
 0x560   :  { %v2805_v12 = vpop.f32.mrb[18].mxu1 }
 0x561   :  { %v1340_v14 = vpop.f32.mrb[19].mxu1 }
 0x562   :  { %2519 = vmatmul.mubr.msk.f32.gmra.mrb[22].mxu0 %vm626_vm0, %v2802_v10 }
 0x563   :  { %1537 = vmatprep.mubr.f32.mxu0 %v3094_v61 }
 0x564   :  { %v2808_v18 = vpop.f32.mrb[20].mxu1 }
 0x565   :  { %v1350_v19 = vpop.f32.mrb[21].mxu1 }
 0x566   :  { %2520 = vmatmul.mubr.msk.f32.gmra.mrb[24].mxu0 %vm626_vm0, %v1340_v14 }
 0x567   :  { %1543 = vmatprep.mubr.f32.mxu0 %v3094_v61 }
 0x568   :  { %v2811_v20 = vpop.f32.mrb[22].mxu1 }
 0x569   :  { %v1360_v21 = vpop.f32.mrb[23].mxu1 }
 0x56a   :  { %2521 = vmatmul.mubr.msk.f32.gmra.mrb[26].mxu0 %vm626_vm0, %v2805_v12 }
 0x56b   :  { %1549 = vmatprep.mubr.f32.mxu0 %v3094_v61 }
 0x56c   :  { %v2814_v23 = vpop.f32.mrb[24].mxu1 }
 0x56d   :  { %v1370_v27 = vpop.f32.mrb[25].mxu1 }
 0x56e   :  { %2522 = vmatmul.mubr.msk.f32.gmra.mrb[28].mxu0 %vm626_vm0, %v1350_v19 }
 0x56f   :  { %1555 = vmatprep.mubr.f32.mxu0 %v3094_v61 }
 0x570   :  { %v2817_v28 = vpop.f32.mrb[26].mxu1 }
 0x571   :  { %v1380_v29 = vpop.f32.mrb[27].mxu1 }
 0x572   :  { %2523 = vmatmul.mubr.msk.f32.gmra.mrb[30].mxu0 %vm626_vm0, %v2808_v18 }
 0x573   :  { %1561 = vmatprep.mubr.f32.mxu0 %v3094_v61 }
 0x574   :  { %v2820_v26 = vpop.f32.mrb[28].mxu1 }
 0x575   :  { %v1390_v31 = vpop.f32.mrb[29].mxu1 }
 0x576   :  { %2524 = vmatmul.mubr.msk.f32.gmra.mrb[32].mxu0 %vm626_vm0, %v1360_v21  ;;  %v1675_v21 = vpop.permute.xlu1 %1674 }
 0x577   :  { %1567 = vmatprep.mubr.f32.mxu0 %v3094_v61 }
 0x578   :  { %v2823_v15 = vpop.f32.mrb[30].mxu1 }
 0x579   :  { %v1400_v22 = vpop.f32.mrb[31].mxu1 }
 0x57a   :  { %2525 = vmatmul.mubr.msk.f32.gmra.mrb[34].mxu0 %vm626_vm0, %v2811_v20 }
 0x57b   :  { %1573 = vmatprep.mubr.f32.mxu0 %v3094_v61 }
 0x57e   :  { %2526 = vmatmul.mubr.msk.f32.gmra.mrb[36].mxu0 %vm626_vm0, %v1370_v27 }
 0x57f   :  { %1579 = vmatprep.mubr.f32.mxu0 %v3094_v61 }
 0x582   :  { %2527 = vmatmul.mubr.msk.f32.gmra.mrb[38].mxu0 %vm626_vm0, %v2814_v23 }
 0x583   :  { %1585 = vmatprep.mubr.f32.mxu0 %v3094_v61 }
 0x586   :  { %2528 = vmatmul.mubr.msk.f32.gmra.mrb[40].mxu0 %vm626_vm0, %v1380_v29 }
 0x587   :  { %1591 = vmatprep.mubr.f32.mxu0 %v3094_v61 }
 0x58a   :  { %2529 = vmatmul.mubr.msk.f32.gmra.mrb[42].mxu0 %vm626_vm0, %v2817_v28 }
 0x58b   :  { %1597 = vmatprep.mubr.f32.mxu0 %v3094_v61 }
 0x58e   :  { %2530 = vmatmul.mubr.msk.f32.gmra.mrb[44].mxu0 %vm626_vm0, %v1390_v31 }
 0x58f   :  { %1603 = vmatprep.mubr.f32.mxu0 %v3094_v61 }
 0x592   :  { %2531 = vmatmul.mubr.msk.f32.gmra.mrb[46].mxu0 %vm626_vm0, %v2820_v26 }
 0x593   :  { %1609 = vmatprep.mubr.f32.mxu0 %v3094_v61 }
 0x596   :  { %2532 = vmatmul.mubr.msk.f32.gmra.mrb[48].mxu0 %vm626_vm0, %v1400_v22 }
 0x597   :  { %1615 = vmatprep.mubr.f32.mxu0 %v3094_v61  ;;  %v1665_v61 = vpop.permute.xlu0 %1664 }
 0x59a   :  { %2533 = vmatmul.mubr.msk.f32.gmra.mrb[50].mxu0 %vm626_vm0, %v2823_v15 }
 0x59b   :  { %v1680_v22 = vpop.permute.xlu0 %1679 }
 0x631   :  { %v1527_v33 = vpop.f32.mrb[20].mxu0 }
 0x632   :  { %v1529_v35 = vpop.f32.mrb[21].mxu0  ;;  %v1622_v53 = vsub.f32 %v3592_v34, %v1527_v33 }
 0x633   :  { %v1623_v54 = vsub.f32 %v3575_v25, %v1529_v35 }
 0x635   :  { %v1533_v32 = vpop.f32.mrb[22].mxu0 }
 0x636   :  { %v1535_v37 = vpop.f32.mrb[23].mxu0  ;;  %v1624_v63 = vsub.f32 %v3690_v16, %v1533_v32 }
 0x637   :  { %v1625_v3 = vsub.f32 %v3673_v1, %v1535_v37 }
 0x639   :  { %v1539_v30 = vpop.f32.mrb[24].mxu0 }
 0x63a   :  { %v1541_v38 = vpop.f32.mrb[25].mxu0  ;;  %v1626_v10 = vsub.f32 %v3788_v0, %v1539_v30 }
 0x63b   :  { %v1627_v16 = vsub.f32 %v3771_v47, %v1541_v38 }
 0x63d   :  { %v1545_v39 = vpop.f32.mrb[26].mxu0 }
 0x63e   :  { %v1547_v40 = vpop.f32.mrb[27].mxu0  ;;  %v1628_v27 = vsub.f32 %v3848_v42, %v1545_v39 }
 0x63f   :  { %v1629_v28 = vsub.f32 %v3839_v36, %v1547_v40 }
 0x641   :  { %v1551_v41 = vpop.f32.mrb[28].mxu0 }
 0x642   :  { %v4139_v43 = vpop.f32.mrb[29].mxu0  ;;  %v1630_v32 = vsub.f32 %v3878_v13, %v1551_v41 }
 0x643   :  { %v1631_v36 = vsub.f32 %v3869_v6, %v4139_v43 }
 0x645   :  { %v4141_v45 = vpop.f32.mrb[30].mxu0 }
 0x646   :  { %v4143_v46 = vpop.f32.mrb[31].mxu0 }
 0x647   :  { %v1633_v43 = vsub.f32 %v3899_v44, %v4143_v46 }
 0x649   :  { %v4145_v48 = vpop.f32.mrb[32].mxu0 }
 0x64a   :  { %v4147_v49 = vpop.f32.mrb[33].mxu0  ;;  %v1634_v44 = vsub.f32 %v3938_v24, %v4145_v48 }
 0x64d   :  { %v4149_v50 = vpop.f32.mrb[34].mxu0 }
 0x64e   :  { %v4151_v52 = vpop.f32.mrb[35].mxu0 }
 0x651   :  { %v1575_v57 = vpop.f32.mrb[36].mxu0 }
 0x652   :  { %v1638_v58 = vmul.f32 %v1622_v53, %v1575_v57  ;;  %v1577_v59 = vpop.f32.mrb[37].mxu0 }
 0x653   :  { %v1639_v60 = vmul.f32 %v1623_v54, %v1577_v59  ;;  %v1632_v59 = vsub.f32 %v3908_v51, %v4141_v45  ;;  %v1690_v51 = vpop.permute.xlu0 %1689 }
 0x654   :  { %v4156_v2 = vadd.f32 %v1665_v61, %v1638_v58  ;;  %v1685_v58 = vpop.permute.xlu1 %1684 }
 0x655   :  { %v4159_v4 = vadd.f32 %v1665_v61, %v1639_v60  ;;  %v1581_v62 = vpop.f32.mrb[38].mxu0 }
 0x656   :  { %v2534_v7 = vmul.f32 -1.442695, %v4156_v2  ;;  %v1640_v34 = vmul.f32 %v1624_v63, %v1581_v62  ;;  %v1583_v8 = vpop.f32.mrb[39].mxu0 }
 0x657   :  { %v2535_v25 = vmul.f32 -1.442695, %v4159_v4  ;;  %v1641_v9 = vmul.f32 %v1625_v3, %v1583_v8 }
 0x658   :  { %3023 = vpow2.f32 %v2534_v7  ;;  %v4164_v11 = vadd.f32 %v1670_v5, %v1640_v34  ;;  %v1695_v24 = vpop.permute.xlu1 %1694 }
 0x659   :  { %3025 = vpow2.f32 %v2535_v25  ;;  %v4167_v1 = vadd.f32 %v1670_v5, %v1641_v9  ;;  %v1587_v12 = vpop.f32.mrb[40].mxu0 }
 0x65a   :  { %v2536_v14 = vmul.f32 -1.442695, %v4164_v11  ;;  %v1642_v18 = vmul.f32 %v1626_v10, %v1587_v12  ;;  %v1589_v19 = vpop.f32.mrb[41].mxu0  ;;  %v1635_v10 = vsub.f32 %v3929_v17, %v4147_v49  ;;  %v1636_v17 = vsub.f32 %v3965_v56, %v4149_v50  ;;  %v1700_v56 = vpop.permute.xlu0 %1699 }
 0x65b   :  { %v2537_v20 = vmul.f32 -1.442695, %v4167_v1  ;;  %v1643_v23 = vmul.f32 %v1627_v16, %v1589_v19 }
 0x65c   :  { %3027 = vpow2.f32 %v2536_v14  ;;  %v4172_v0 = vadd.f32 %v1675_v21, %v1642_v18 }
 0x65d   :  { %3029 = vpow2.f32 %v2537_v20  ;;  %v4175_v47 = vadd.f32 %v1675_v21, %v1643_v23  ;;  %v1593_v29 = vpop.f32.mrb[42].mxu0 }
 0x65e   :  { %v2538_v26 = vmul.f32 -1.442695, %v4172_v0  ;;  %v1644_v31 = vmul.f32 %v1628_v27, %v1593_v29  ;;  %v1595_v15 = vpop.f32.mrb[43].mxu0  ;;  %v1637_v29 = vsub.f32 %v3962_v55, %v4151_v52 }
 0x65f   :  { %v2539_v33 = vmul.f32 -1.442695, %v4175_v47  ;;  %v1645_v35 = vmul.f32 %v1629_v28, %v1595_v15 }
 0x660   :  { %3031 = vpow2.f32 %v2538_v26  ;;  %v4180_v42 = vadd.f32 %v1680_v22, %v1644_v31 }
 0x661   :  { %3033 = vpow2.f32 %v2539_v33  ;;  %v4184_v37 = vadd.f32 %v1680_v22, %v1645_v35  ;;  %v1599_v30 = vpop.f32.mrb[44].mxu0 }
 0x662   :  { %v3024_v38 = vpop.eup %3023  ;;  %v2540_v39 = vmul.f32 -1.442695, %v4180_v42  ;;  %v1646_v40 = vmul.f32 %v1630_v32, %v1599_v30  ;;  %v1601_v53 = vpop.f32.mrb[45].mxu0 }
 0x663   :  { %v3026_v54 = vpop.eup %3025  ;;  %v1766_v57 = vadd.f32 1.0, %v3024_v38  ;;  %v2541_v13 = vmul.f32 -1.442695, %v4184_v37  ;;  %v1647_v41 = vmul.f32 %v1631_v36, %v1601_v53 }
 0x664   :  { %v1767_v60 = vadd.f32 1.0, %v3026_v54  ;;  %3035 = vpow2.f32 %v2540_v39  ;;  %v4190_v6 = vadd.f32 %v1685_v58, %v1646_v40 }
 0x665   :  { %3037 = vrcp.f32 %v1766_v57  ;;  %v4194_v61 = vadd.f32 %v1685_v58, %v1647_v41  ;;  %v1605_v63 = vpop.f32.mrb[46].mxu0 }
 0x666   :  { %v3028_v3 = vpop.eup %3027  ;;  %3039 = vrcp.f32 %v1767_v60  ;;  %v2542_v5 = vmul.f32 -1.442695, %v4190_v6  ;;  %v1648_v62 = vmul.f32 %v1632_v59, %v1605_v63  ;;  %v1607_v7 = vpop.f32.mrb[47].mxu0 }
 0x667   :  { %v3030_v34 = vpop.eup %3029  ;;  %v1768_v8 = vadd.f32 1.0, %v3028_v3  ;;  %3041 = vpow2.f32 %v2541_v13  ;;  %v2543_v45 = vmul.f32 -1.442695, %v4194_v61  ;;  %v1649_v25 = vmul.f32 %v1633_v43, %v1607_v7 }
 0x668   :  { %v1769_v46 = vadd.f32 1.0, %v3030_v34  ;;  %3043 = vpow2.f32 %v2542_v5  ;;  %v4200_v9 = vadd.f32 %v1690_v51, %v1648_v62 }
 0x669   :  { %3045 = vrcp.f32 %v1768_v8  ;;  %v4204_v16 = vadd.f32 %v1690_v51, %v1649_v25  ;;  %v1611_v12 = vpop.f32.mrb[48].mxu0 }
 0x66a   :  { %v3032_v14 = vpop.eup %3031  ;;  %3047 = vrcp.f32 %v1769_v46  ;;  %v2544_v18 = vmul.f32 -1.442695, %v4200_v9  ;;  %v1650_v19 = vmul.f32 %v1634_v44, %v1611_v12  ;;  %v1613_v20 = vpop.f32.mrb[49].mxu0 }
 0x66b   :  { %v3034_v21 = vpop.eup %3033  ;;  %v1770_v23 = vadd.f32 1.0, %v3032_v14  ;;  %3049 = vpow2.f32 %v2543_v45  ;;  %v2545_v48 = vmul.f32 -1.442695, %v4204_v16  ;;  %v1651_v27 = vmul.f32 %v1635_v10, %v1613_v20 }
 0x66c   :  { %v1771_v49 = vadd.f32 1.0, %v3034_v21  ;;  %3051 = vpow2.f32 %v2544_v18  ;;  %v4210_v28 = vadd.f32 %v1695_v24, %v1650_v19 }
 0x66d   :  { %3053 = vrcp.f32 %v1770_v23  ;;  %v4214_v26 = vadd.f32 %v1695_v24, %v1651_v27  ;;  %v1617_v31 = vpop.f32.mrb[50].mxu0 }
 0x66e   :  { %v3036_v15 = vpop.eup %3035  ;;  %3055 = vrcp.f32 %v1771_v49  ;;  %v2546_v22 = vmul.f32 -1.442695, %v4210_v28  ;;  %v1652_v33 = vmul.f32 %v1636_v17, %v1617_v31  ;;  %v1619_v35 = vpop.f32.mrb[51].mxu0 }
 0x66f   :  { %v3038_v32 = vpop.eup %3037  ;;  %v1772_v36 = vadd.f32 1.0, %v3036_v15  ;;  %3057 = vpow2.f32 %v2545_v48  ;;  %v2547_v50 = vmul.f32 -1.442695, %v4214_v26  ;;  %v1653_v30 = vmul.f32 %v1637_v29, %v1619_v35 }
 0x670   :  { %v3040_v38 = vpop.eup %3039  ;;  %v4219_v55 = vmul.f32 %v3038_v32, %v4156_v2  ;;  %3059 = vpow2.f32 %v2546_v22  ;;  %v4221_v52 = vadd.f32 %v1700_v56, %v1652_v33 }
 0x671   :  { %v3042_v39 = vpop.eup %3041  ;;  %3061 = vrcp.f32 %v1772_v36  ;;  %v4223_v40 = vadd.f32 %v1700_v56, %v1653_v30  ;;  %v4230_v59 = vmul.f32 %v3040_v38, %v4159_v4  ;;  %v1987_v56 = vld [vmem:[%s4805_s6 + $0x8] sm:$0xff]  ;;  %v1996_v30 = vld [vmem:[%s4804_s7 + $0x10] sm:$0xff] }
 0x672   :  { %v3044_v53 = vpop.eup %3043  ;;  %v1773_v54 = vadd.f32 1.0, %v3042_v39  ;;  %3063 = vpow2.f32 %v2547_v50  ;;  %v2548_v57 = vmul.f32 -1.442695, %v4221_v52  ;;  %1830 = vrot.lane.b32.xlu1 %v4219_v55, %s3096_s5  ;;  %v1994_v50 = vld [vmem:[%s4804_s7] sm:$0xff]  ;;  %2550 = vmatprep.mubr.msk.f32.mxu1 %vm653_vm3, %v1987_v56  ;;  %v1995_v38 = vld [vmem:[%s4804_s7 + $0x8] sm:$0xff]  ;;  %v1862_v39 = vlaneseq }
 0x673   :  { %v3046_v58 = vpop.eup %3045  ;;  %v1774_v13 = vadd.f32 1.0, %v3044_v53  ;;  %v2549_v2 = vmul.f32 -1.442695, %v4223_v40 }
 0x674   :  { %v3048_v41 = vpop.eup %3047  ;;  %v4233_v60 = vmul.f32 %v3046_v58, %v4164_v11  ;;  %3065 = vrcp.f32 %v1773_v54  ;;  %v4354_v54 = vand.u32 127, %v1862_v39 }
 0x675   :  { %v3050_v43 = vpop.eup %3049  ;;  %v4236_v63 = vmul.f32 %v3048_v41, %v4167_v1  ;;  %3067 = vrcp.f32 %v1774_v13  ;;  %v1881_v13 = vld [vmem:[%s4806_s8] sm:$0x3] }
 0x676   :  { %v3052_v3 = vpop.eup %3051  ;;  %v1775_v5 = vadd.f32 1.0, %v3050_v43  ;;  %3069 = vpow2.f32 %v2548_v57  ;;  %1846 = vrot.lane.b32.xlu1 %v4230_v59, %s3096_s5  ;;  %1832 = vrot.lane.b32.xlu0 %v4233_v60, %s3096_s5  ;;  %v2942_v4 = vpack.c.bf16 %v4233_v60, %v4219_v55  ;;  %vm1864_vm7 = vcmp.lt.s32.totalorder %v4354_v54, 1 }
 0x677   :  { %v3054_v11 = vpop.eup %3053  ;;  %v1776_v62 = vadd.f32 1.0, %v3052_v3  ;;  %3071 = vpow2.f32 %v2549_v2  ;;  %v2940_v1 = vpack.c.bf16 %v4236_v63, %v4230_v59  ;;  %vm1941_vm8 = vcmp.lt.s32.totalorder %v4354_v54, 127  ;;  %v1988_v54 = vld [vmem:[%s4805_s6 + $0x10] sm:$0xff] }
 0x678   :  { %v3056_v7 = vpop.eup %3055  ;;  %v4247_v34 = vmul.f32 %v3054_v11, %v4172_v0  ;;  %3073 = vrcp.f32 %v1775_v5 }
 0x679   :  { %v3058_v8 = vpop.eup %3057  ;;  %3075 = vrcp.f32 %v1776_v62  ;;  %v4254_v10 = vmul.f32 %v3056_v7, %v4175_v47 }
 0x67a   :  { %v3060_v51 = vpop.eup %3059  ;;  %v1777_v45 = vadd.f32 1.0, %v3058_v8  ;;  %1848 = vrot.lane.b32.xlu0 %v4236_v63, %s3096_s5  ;;  %1834 = vrot.lane.b32.xlu1 %v4247_v34, %s3096_s5 }
 0x67b   :  { %v3062_v25 = vpop.eup %3061  ;;  %v1778_v44 = vadd.f32 1.0, %v3060_v51 }
 0x67c   :  { %v3064_v46 = vpop.eup %3063  ;;  %v4257_v0 = vmul.f32 %v3062_v25, %v4180_v42  ;;  %3077 = vrcp.f32 %v1777_v45 }
 0x67d   :  { %3079 = vrcp.f32 %v1778_v44  ;;  %v1779_v12 = vadd.f32 1.0, %v3064_v46 }
 0x67e   :  { %v3066_v14 = vpop.eup %3065  ;;  %1850 = vrot.lane.b32.xlu1 %v4254_v10, %s3096_s5  ;;  %1836 = vrot.lane.b32.xlu0 %v4257_v0, %s3096_s5  ;;  %v2946_v18 = vpack.c.bf16 %v4257_v0, %v4247_v34 }
 0x67f   :  { %v3068_v19 = vpop.eup %3067  ;;  %v4266_v47 = vmul.f32 %v3066_v14, %v4184_v37  ;;  %3081 = vrcp.f32 %v1779_v12 }
 0x680   :  { %v3070_v42 = vpop.eup %3069  ;;  %v4269_v20 = vmul.f32 %v3068_v19, %v4190_v6 }
 0x681   :  { %v3072_v21 = vpop.eup %3071  ;;  %v1780_v23 = vadd.f32 1.0, %v3070_v42  ;;  %v2944_v24 = vpack.c.bf16 %v4266_v47, %v4254_v10 }
 0x682   :  { %v3074_v48 = vpop.eup %3073  ;;  %v1781_v27 = vadd.f32 1.0, %v3072_v21  ;;  %1852 = vrot.lane.b32.xlu0 %v4266_v47, %s3096_s5  ;;  %1838 = vrot.lane.b32.xlu1 %v4269_v20, %s3096_s5 }
 0x683   :  { %v3076_v37 = vpop.eup %3075  ;;  %3083 = vrcp.f32 %v1780_v23  ;;  %v4278_v17 = vmul.f32 %v3074_v48, %v4194_v61 }
 0x684   :  { %v4281_v6 = vmul.f32 %v3076_v37, %v4200_v9  ;;  %3085 = vrcp.f32 %v1781_v27 }
 0x686   :  { %v3078_v49 = vpop.eup %3077  ;;  %1854 = vrot.lane.b32.xlu1 %v4278_v17, %s3096_s5  ;;  %1840 = vrot.lane.b32.xlu0 %v4281_v6, %s3096_s5  ;;  %v2950_v29 = vpack.c.bf16 %v4281_v6, %v4269_v20 }
 0x687   :  { %v3080_v31 = vpop.eup %3079  ;;  %v4290_v15 = vmul.f32 %v3078_v49, %v4204_v16 }
 0x688   :  { %v4293_v61 = vmul.f32 %v3080_v31, %v4210_v28 }
 0x689   :  { %v3082_v9 = vpop.eup %3081  ;;  %v2948_v22 = vpack.c.bf16 %v4290_v15, %v4278_v17 }
 0x68a   :  { %1856 = vrot.lane.b32.xlu0 %v4290_v15, %s3096_s5  ;;  %1842 = vrot.lane.b32.xlu1 %v4293_v61, %s3096_s5  ;;  %v4302_v33 = vmul.f32 %v3082_v9, %v4214_v26 }
 0x68d   :  { %v3084_v35 = vpop.eup %3083 }
 0x68e   :  { %v3086_v32 = vpop.eup %3085  ;;  %v4305_v16 = vmul.f32 %v3084_v35, %v4221_v52  ;;  %1858 = vrot.lane.b32.xlu1 %v4302_v33, %s3096_s5  ;;  %v1997_v52 = vld [vmem:[%s4804_s7 + $0x18] sm:$0xff] }
 0x68f   :  { %v4310_v28 = vmul.f32 %v3086_v32, %v4223_v40  ;;  %v4352_v40 = vshrl.u32 %v1862_v39, 7 }
 0x690   :  { %1844 = vrot.lane.b32.xlu0 %v4305_v16, %s3096_s5  ;;  %v2954_v36 = vpack.c.bf16 %v4305_v16, %v4293_v61 }
 0x691   :  { %v2952_v26 = vpack.c.bf16 %v4310_v28, %v4302_v33  ;;  %v1885_v57 = vsub.s32 0, %v4352_v40  ;;  %v1889_v58 = vsub.s32 1, %v4352_v40 }
 0x692   :  { %1909 = vrot.lane.b32.xlu1 %v4219_v55, %s3097_s1 }
 0x693   :  { %v1886_v43 = vrot.slane %v1881_v13, %v1885_v57  ;;  %v1890_v3 = vrot.slane %v1881_v13, %v1889_v58 }
 0x694   :  { %1860 = vrot.lane.b32.xlu0 %v4310_v28, %s3096_s5 }
 0x696   :  { %1925 = vrot.lane.b32.xlu1 %v4230_v59, %s3097_s1 }
 0x698   :  { %1911 = vrot.lane.b32.xlu0 %v4233_v60, %s3097_s1 }
 0x69a   :  { %1913 = vrot.lane.b32.xlu1 %v4247_v34, %s3097_s1 }
 0x69c   :  { %1927 = vrot.lane.b32.xlu0 %v4236_v63, %s3097_s1 }
 0x69e   :  { %1929 = vrot.lane.b32.xlu1 %v4254_v10, %s3097_s1 }
 0x6a0   :  { %1915 = vrot.lane.b32.xlu0 %v4257_v0, %s3097_s1 }
 0x6a2   :  { %1917 = vrot.lane.b32.xlu1 %v4269_v20, %s3097_s1 }
 0x6a4   :  { %1931 = vrot.lane.b32.xlu0 %v4266_v47, %s3097_s1 }
 0x6a6   :  { %1933 = vrot.lane.b32.xlu1 %v4278_v17, %s3097_s1 }
 0x6a8   :  { %1919 = vrot.lane.b32.xlu0 %v4281_v6, %s3097_s1 }
 0x6aa   :  { %1921 = vrot.lane.b32.xlu1 %v4293_v61, %s3097_s1 }
 0x6ac   :  { %1935 = vrot.lane.b32.xlu0 %v4290_v15, %s3097_s1 }
 0x6ae   :  { %1937 = vrot.lane.b32.xlu1 %v4302_v33, %s3097_s1 }
 0x6b0   :  { %1923 = vrot.lane.b32.xlu0 %v4305_v16, %s3097_s1 }
 0x6b2   :  { %2000 = vperm.xlu1 %3014, %v1994_v50  }
 0x6b4   :  { %1939 = vrot.lane.b32.xlu0 %v4310_v28, %s3097_s1 }
 0x6b6   :  { %2010 = vperm.xlu1 %3014, %v1996_v30  }
 0x6b8   :  { %2005 = vperm.xlu0 %3013, %v1995_v38  }
 0x6bc   :  { %2015 = vperm.xlu0 %3013, %v1997_v52  }
 0x6e4   :  { %v1831_v53 = vpop.permute.xlu1 %1830 }
 0x6e8   :  { %v1847_v2 = vpop.permute.xlu1 %1846  ;;  %v1833_v41 = vpop.permute.xlu0 %1832 }
 0x6e9   :  { %v1865_v5 = vsel %vm1864_vm7, %v1831_v53, %v1847_v2  ;;  %v1873_v11 = vsel %vm1864_vm7, %v1847_v2, %v1831_v53 }
 0x6ea   :  { %v1893_v45 = vmul.f32 %v1886_v43, %v1873_v11  ;;  %v1894_v25 = vmul.f32 %v1890_v3, %v1865_v5 }
 0x6ec   :  { %v1849_v62 = vpop.permute.xlu0 %1848  ;;  %v1835_v7 = vpop.permute.xlu1 %1834 }
 0x6ed   :  { %v1866_v8 = vsel %vm1864_vm7, %v1833_v41, %v1849_v62  ;;  %v1874_v51 = vsel %vm1864_vm7, %v1849_v62, %v1833_v41 }
 0x6ee   :  { %v1895_v44 = vmul.f32 %v1886_v43, %v1874_v51  ;;  %v1896_v46 = vmul.f32 %v1890_v3, %v1866_v8 }
 0x6f0   :  { %v2926_v12 = vpack.c.bf16 %v1895_v44, %v1893_v45  ;;  %v1851_v14 = vpop.permute.xlu1 %1850  ;;  %v1837_v19 = vpop.permute.xlu0 %1836  ;;  %v2924_v42 = vpack.c.bf16 %v1896_v46, %v1894_v25 }
 0x6f1   :  { %v1867_v21 = vsel %vm1864_vm7, %v1835_v7, %v1851_v14  ;;  %v1875_v23 = vsel %vm1864_vm7, %v1851_v14, %v1835_v7 }
 0x6f2   :  { %2925 = vmatprep.subr.bf16.mxu1 %v2924_v42  ;;  %v1897_v31 = vmul.f32 %v1886_v43, %v1875_v23  ;;  %v1898_v9 = vmul.f32 %v1890_v3, %v1867_v21 }
 0x6f3   :  { %2927 = vmatpush1.bf16.msra.mxu1 %v2926_v12 }
 0x6f4   :  { %v1853_v48 = vpop.permute.xlu0 %1852  ;;  %v1839_v27 = vpop.permute.xlu1 %1838 }
 0x6f5   :  { %v1868_v37 = vsel %vm1864_vm7, %v1837_v19, %v1853_v48  ;;  %v1876_v49 = vsel %vm1864_vm7, %v1853_v48, %v1837_v19 }
 0x6f6   :  { %v1899_v35 = vmul.f32 %v1886_v43, %v1876_v49  ;;  %v1900_v32 = vmul.f32 %v1890_v3, %v1868_v37 }
 0x6f8   :  { %v2930_v56 = vpack.c.bf16 %v1899_v35, %v1897_v31  ;;  %v1855_v50 = vpop.permute.xlu1 %1854  ;;  %v1841_v30 = vpop.permute.xlu0 %1840  ;;  %v2928_v38 = vpack.c.bf16 %v1900_v32, %v1898_v9 }
 0x6f9   :  { %v1869_v52 = vsel %vm1864_vm7, %v1839_v27, %v1855_v50  ;;  %v1877_v39 = vsel %vm1864_vm7, %v1855_v50, %v1839_v27 }
 0x6fa   :  { %2929 = vmatprep.subr.bf16.mxu1 %v2928_v38  ;;  %v1901_v5 = vmul.f32 %v1886_v43, %v1877_v39  ;;  %v1902_v11 = vmul.f32 %v1890_v3, %v1869_v52 }
 0x6fb   :  { %2931 = vmatpush1.bf16.msra.mxu1 %v2930_v56 }
 0x6fc   :  { %v1857_v53 = vpop.permute.xlu0 %1856  ;;  %v1843_v13 = vpop.permute.xlu1 %1842 }
 0x6fd   :  { %v1870_v2 = vsel %vm1864_vm7, %v1841_v30, %v1857_v53  ;;  %v1878_v41 = vsel %vm1864_vm7, %v1857_v53, %v1841_v30 }
 0x6fe   :  { %v1903_v62 = vmul.f32 %v1886_v43, %v1878_v41  ;;  %v1904_v7 = vmul.f32 %v1890_v3, %v1870_v2 }
 0x700   :  { %v2934_v8 = vpack.c.bf16 %v1903_v62, %v1901_v5  ;;  %v1859_v51 = vpop.permute.xlu1 %1858  ;;  %v2932_v45 = vpack.c.bf16 %v1904_v7, %v1902_v11 }
 0x701   :  { %v1871_v46 = vsel %vm1864_vm7, %v1843_v13, %v1859_v51  ;;  %v1879_v12 = vsel %vm1864_vm7, %v1859_v51, %v1843_v13 }
 0x702   :  { %v1845_v25 = vpop.permute.xlu0 %1844  ;;  %2933 = vmatprep.subr.bf16.mxu1 %v2932_v45  ;;  %v1905_v21 = vmul.f32 %v1886_v43, %v1879_v12  ;;  %v1906_v23 = vmul.f32 %v1890_v3, %v1871_v46 }
 0x703   :  { %2935 = vmatpush1.bf16.msra.mxu1 %v2934_v8 }
 0x704   :  { %v1910_v44 = vpop.permute.xlu1 %1909 }
 0x706   :  { %v1861_v14 = vpop.permute.xlu0 %1860 }
 0x707   :  { %v1872_v19 = vsel %vm1864_vm7, %v1845_v25, %v1861_v14  ;;  %v1880_v42 = vsel %vm1864_vm7, %v1861_v14, %v1845_v25 }
 0x708   :  { %v1907_v48 = vmul.f32 %v1886_v43, %v1880_v42  ;;  %v1908_v27 = vmul.f32 %v1890_v3, %v1872_v19  ;;  %v1926_v37 = vpop.permute.xlu1 %1925  ;;  %v1958_v3 = vld [vmem:[%s4807_s9] sm:$0x3] }
 0x709   :  { %v1967_v55 = vrot.slane %v1958_v3, %v1889_v58  ;;  %v1950_v63 = vsel %vm1941_vm8, %v1926_v37, %v1910_v44  ;;  %v1963_v34 = vrot.slane %v1958_v3, %v1885_v57 }
 0x70a   :  { %v2938_v49 = vpack.c.bf16 %v1907_v48, %v1905_v21  ;;  %v1912_v31 = vpop.permute.xlu0 %1911  ;;  %v2936_v9 = vpack.c.bf16 %v1908_v27, %v1906_v23  ;;  %v1986_v23 = vld [vmem:[%s4805_s6] sm:$0xff]  ;;  %v1989_v48 = vld [vmem:[%s4805_s6 + $0x18] sm:$0xff]  ;;  %v1991_v27 = vld [vmem:[%s4805_s6 + $0x28] sm:$0xff] }
 0x70b   :  { %v1971_v47 = vmul.f32 %v1967_v55, %v1950_v63 }
 0x70c   :  { %2937 = vmatprep.subr.bf16.mxu1 %v2936_v9  ;;  %v1914_v35 = vpop.permute.xlu1 %1913 }
 0x70d   :  { %2939 = vmatpush1.bf16.msra.mxu1 %v2938_v49  ;;  %v1993_v49 = vld [vmem:[%s4805_s6 + $0x38] sm:$0xff] }
 0x70e   :  { %2941 = vmatprep.subr.bf16.mxu1 %v2940_v1  ;;  %v1928_v32 = vpop.permute.xlu0 %1927 }
 0x70f   :  { %v1951_v59 = vsel %vm1941_vm8, %v1928_v32, %v1912_v31 }
 0x710   :  { %v1930_v56 = vpop.permute.xlu1 %1929  ;;  %v1973_v1 = vmul.f32 %v1967_v55, %v1951_v59 }
 0x711   :  { %2943 = vmatpush1.bf16.msra.mxu1 %v2942_v4  ;;  %v1943_v4 = vsel %vm1941_vm8, %v1912_v31, %v1928_v32  ;;  %v1952_v15 = vsel %vm1941_vm8, %v1930_v56, %v1914_v35  ;;  %v1992_v31 = vld [vmem:[%s4805_s6 + $0x30] sm:$0xff] }
 0x712   :  { %2945 = vmatprep.subr.bf16.mxu1 %v2944_v24  ;;  %v1916_v43 = vpop.permute.xlu0 %1915  ;;  %v1972_v17 = vmul.f32 %v1963_v34, %v1943_v4  ;;  %v2956_v20 = vpack.c.bf16 %v1973_v1, %v1971_v47  ;;  %v1975_v33 = vmul.f32 %v1967_v55, %v1952_v15 }
 0x714   :  { %v1918_v50 = vpop.permute.xlu1 %1917 }
 0x715   :  { %2947 = vmatpush1.bf16.msra.mxu1 %v2946_v18  ;;  %v1942_v18 = vsel %vm1941_vm8, %v1910_v44, %v1926_v37  ;;  %v1990_v37 = vld [vmem:[%s4805_s6 + $0x20] sm:$0xff] }
 0x716   :  { %2949 = vmatprep.subr.bf16.mxu1 %v2948_v22  ;;  %v1932_v60 = vpop.permute.xlu0 %1931  ;;  %v1970_v6 = vmul.f32 %v1963_v34, %v1942_v18 }
 0x717   :  { %v1953_v0 = vsel %vm1941_vm8, %v1932_v60, %v1916_v43  ;;  %v1945_v22 = vsel %vm1941_vm8, %v1916_v43, %v1932_v60 }
 0x718   :  { %v1934_v10 = vpop.permute.xlu1 %1933  ;;  %v1977_v40 = vmul.f32 %v1967_v55, %v1953_v0  ;;  %v1976_v58 = vmul.f32 %v1963_v34, %v1945_v22 }
 0x719   :  { %2951 = vmatpush1.bf16.msra.mxu1 %v2950_v29  ;;  %v1944_v29 = vsel %vm1941_vm8, %v1914_v35, %v1930_v56  ;;  %v1954_v30 = vsel %vm1941_vm8, %v1934_v10, %v1918_v50 }
 0x71a   :  { %v1920_v24 = vpop.permute.xlu0 %1919  ;;  %2953 = vmatprep.subr.bf16.mxu1 %v2952_v26  ;;  %v2958_v26 = vpack.c.bf16 %v1972_v17, %v1970_v6  ;;  %v2960_v61 = vpack.c.bf16 %v1977_v40, %v1975_v33  ;;  %v1974_v16 = vmul.f32 %v1963_v34, %v1944_v29  ;;  %v1979_v53 = vmul.f32 %v1967_v55, %v1954_v30 }
 0x71c   :  { %v1922_v57 = vpop.permute.xlu1 %1921  ;;  %v2962_v41 = vpack.c.bf16 %v1976_v58, %v1974_v16 }
 0x71d   :  { %2955 = vmatpush1.bf16.msra.mxu1 %v2954_v36  ;;  %v1946_v36 = vsel %vm1941_vm8, %v1918_v50, %v1934_v10 }
 0x71e   :  { %v1936_v28 = vpop.permute.xlu0 %1935  ;;  %2957 = vmatprep.subr.bf16.mxu1 %v2956_v20  ;;  %v1978_v62 = vmul.f32 %v1963_v34, %v1946_v36 }
 0x71f   :  { %v1955_v38 = vsel %vm1941_vm8, %v1936_v28, %v1920_v24  ;;  %v1947_v52 = vsel %vm1941_vm8, %v1920_v24, %v1936_v28 }
 0x720   :  { %v1981_v39 = vmul.f32 %v1967_v55, %v1955_v38  ;;  %v1938_v13 = vpop.permute.xlu1 %1937  ;;  %v1980_v5 = vmul.f32 %v1963_v34, %v1947_v52 }
 0x721   :  { %2959 = vmatpush1.bf16.msra.mxu1 %v2958_v26  ;;  %v1948_v7 = vsel %vm1941_vm8, %v1922_v57, %v1938_v13  ;;  %v1956_v8 = vsel %vm1941_vm8, %v1938_v13, %v1922_v57 }
 0x722   :  { %v1924_v2 = vpop.permute.xlu0 %1923  ;;  %2961 = vmatprep.subr.bf16.mxu1 %v2960_v61  ;;  %v2964_v11 = vpack.c.bf16 %v1981_v39, %v1979_v53  ;;  %v2966_v45 = vpack.c.bf16 %v1980_v5, %v1978_v62  ;;  %v1982_v46 = vmul.f32 %v1963_v34, %v1948_v7  ;;  %v1983_v12 = vmul.f32 %v1967_v55, %v1956_v8 }
 0x725   :  { %2963 = vmatpush1.bf16.msra.mxu1 %v2962_v41 }
 0x726   :  { %v1940_v51 = vpop.permute.xlu0 %1939  ;;  %2965 = vmatprep.subr.bf16.mxu1 %v2964_v11 }
 0x727   :  { %v1949_v25 = vsel %vm1941_vm8, %v1924_v2, %v1940_v51  ;;  %v1957_v44 = vsel %vm1941_vm8, %v1940_v51, %v1924_v2 }
 0x728   :  { %v1984_v14 = vmul.f32 %v1963_v34, %v1949_v25  ;;  %v1985_v19 = vmul.f32 %v1967_v55, %v1957_v44 }
 0x729   :  { %2967 = vmatpush1.bf16.msra.mxu1 %v2966_v45 }
 0x72a   :  { %v2970_v42 = vpack.c.bf16 %v1984_v14, %v1982_v46  ;;  %v2968_v21 = vpack.c.bf16 %v1985_v19, %v1983_v12 }
 0x72c   :  { %2969 = vmatprep.subr.bf16.mxu1 %v2968_v21 }
 0x72d   :  { %2971 = vmatpush1.bf16.msra.mxu1 %v2970_v42 }
 0x730   :  { %2095 = vmatmul.mubr.f32.vlgmr.msra.gmra.mrb[32].mxu1 %v1986_v23 }
 0x731   :  { %2551 = vmatprep.mubr.msk.f32.mxu1 %vm653_vm3, %v1989_v48  ;;  %v2001_v9 = vpop.permute.xlu1 %2000 }
 0x734   :  { %2101 = vmatmul.mubr.f32.gmra.mrb[34].mxu1 %v1988_v54 }
 0x735   :  { %2552 = vmatprep.mubr.msk.f32.mxu1 %vm653_vm3, %v1991_v27  ;;  %v2011_v63 = vpop.permute.xlu1 %2010 }
 0x737   :  { %v2006_v3 = vpop.permute.xlu0 %2005 }
 0x738   :  { %2107 = vmatmul.mubr.f32.gmra.mrb[36].mxu1 %v1990_v37 }
 0x739   :  { %2553 = vmatprep.mubr.msk.f32.mxu1 %vm653_vm3, %v1993_v49 }
 0x73b   :  { %v2016_v0 = vpop.permute.xlu0 %2015 }
 0x73c   :  { %2113 = vmatmul.mubr.f32.gmra.mrb[38].mxu1 %v1992_v31 }
 0x803   :  { %v2096_v35 = vpop.f32.mrb[32].mxu1 }
 0x804   :  { %v2097_v32 = vadd.f32 %v2096_v35, %v2001_v9  ;;  %v2098_v56 = vpop.f32.mrb[33].mxu1 }
 0x805   :  { %v2099_v43 = vadd.f32 %v2098_v56, %v2001_v9 }
 0x806   :  { %2119 = vst.msk [vmem:[%s4808_s10] sm:$0xff] %vm626_vm0, %v2097_v32  ;;  %2127 = vrot.lane.b32.xlu1 %v2097_v32, %s3093_s26 }
 0x807   :  { %2582 = vst.msk [vmem:[%s4808_s10 + $0x100] sm:$0xff] %vm626_vm0, %v2099_v43  ;;  %v2102_v50 = vpop.f32.mrb[34].mxu1 }
 0x808   :  { %v2103_v59 = vadd.f32 %v2102_v50, %v2006_v3  ;;  %v2104_v55 = vpop.f32.mrb[35].mxu1 }
 0x809   :  { %v2105_v60 = vadd.f32 %v2104_v55, %v2006_v3 }
 0x80a   :  { %2120 = vst.msk [vmem:[%s4808_s10 + $0x8] sm:$0xff] %vm626_vm0, %v2103_v59  ;;  %2129 = vrot.lane.b32.xlu0 %v2103_v59, %s3093_s26  ;;  %2144 = vrot.lane.b32.xlu1 %v2097_v32, %s3092_s23 }
 0x80b   :  { %2583 = vst.msk [vmem:[%s4808_s10 + $0x108] sm:$0xff] %vm626_vm0, %v2105_v60  ;;  %v2108_v4 = vpop.f32.mrb[36].mxu1 }
 0x80c   :  { %v2109_v1 = vadd.f32 %v2108_v4, %v2011_v63  ;;  %v2110_v10 = vpop.f32.mrb[37].mxu1 }
 0x80d   :  { %v2111_v34 = vadd.f32 %v2110_v10, %v2011_v63 }
 0x80e   :  { %2121 = vst.msk [vmem:[%s4808_s10 + $0x10] sm:$0xff] %vm626_vm0, %v2109_v1  ;;  %2146 = vrot.lane.b32.xlu0 %v2103_v59, %s3092_s23  ;;  %2161 = vrot.lane.b32.xlu1 %v2097_v32, %s3091_s19 }
 0x80f   :  { %2584 = vst.msk [vmem:[%s4808_s10 + $0x110] sm:$0xff] %vm626_vm0, %v2111_v34  ;;  %v2114_v18 = vpop.f32.mrb[38].mxu1 }
 0x810   :  { %v2115_v47 = vadd.f32 %v2114_v18, %v2016_v0  ;;  %v2116_v24 = vpop.f32.mrb[39].mxu1 }
 0x811   :  { %v2117_v17 = vadd.f32 %v2116_v24, %v2016_v0 }
 0x812   :  { %2122 = vst.msk [vmem:[%s4808_s10 + $0x18] sm:$0xff] %vm626_vm0, %v2115_v47  ;;  %2163 = vrot.lane.b32.xlu0 %v2103_v59, %s3091_s19  ;;  %2178 = vrot.lane.b32.xlu1 %v2097_v32, %s3090_s12 }
 0x813   :  { %2585 = vst.msk [vmem:[%s4808_s10 + $0x118] sm:$0xff] %vm626_vm0, %v2117_v17 }
 0x816   :  { %2180 = vrot.lane.b32.xlu0 %v2103_v59, %s3090_s12  ;;  %2195 = vrot.lane.b32.xlu1 %v2097_v32, %s3089_s27 }
 0x81a   :  { %2197 = vrot.lane.b32.xlu0 %v2103_v59, %s3089_s27  ;;  %2212 = vrot.lane.b32.xlu1 %v2097_v32, %s3087_s17 }
 0x81e   :  { %2214 = vrot.lane.b32.xlu0 %v2103_v59, %s3087_s17  ;;  %2229 = vrot.lane.b32.xlu1 %v2097_v32, %s3088_s18 }
 0x822   :  { %2231 = vrot.lane.b32.xlu0 %v2103_v59, %s3088_s18  ;;  %2255 = vrot.lane.b32.xlu1 %v2099_v43, %s3093_s26 }
 0x826   :  { %2257 = vrot.lane.b32.xlu0 %v2105_v60, %s3093_s26  ;;  %2272 = vrot.lane.b32.xlu1 %v2099_v43, %s3092_s23 }
 0x82a   :  { %2274 = vrot.lane.b32.xlu0 %v2105_v60, %s3092_s23  ;;  %2289 = vrot.lane.b32.xlu1 %v2099_v43, %s3091_s19 }
 0x82e   :  { %2291 = vrot.lane.b32.xlu0 %v2105_v60, %s3091_s19  ;;  %2306 = vrot.lane.b32.xlu1 %v2099_v43, %s3090_s12 }
 0x832   :  { %2308 = vrot.lane.b32.xlu0 %v2105_v60, %s3090_s12  ;;  %2323 = vrot.lane.b32.xlu1 %v2099_v43, %s3089_s27 }
 0x836   :  { %2325 = vrot.lane.b32.xlu0 %v2105_v60, %s3089_s27  ;;  %2340 = vrot.lane.b32.xlu1 %v2099_v43, %s3087_s17 }
 0x83a   :  { %2342 = vrot.lane.b32.xlu0 %v2105_v60, %s3087_s17  ;;  %2357 = vrot.lane.b32.xlu1 %v2099_v43, %s3088_s18 }
 0x83e   :  { %2359 = vrot.lane.b32.xlu0 %v2105_v60, %s3088_s18  ;;  %2131 = vrot.lane.b32.xlu1 %v2109_v1, %s3093_s26 }
 0x842   :  { %2133 = vrot.lane.b32.xlu0 %v2115_v47, %s3093_s26  ;;  %2148 = vrot.lane.b32.xlu1 %v2109_v1, %s3092_s23 }
 0x846   :  { %2150 = vrot.lane.b32.xlu0 %v2115_v47, %s3092_s23  ;;  %2165 = vrot.lane.b32.xlu1 %v2109_v1, %s3091_s19 }
 0x84a   :  { %2167 = vrot.lane.b32.xlu0 %v2115_v47, %s3091_s19  ;;  %2182 = vrot.lane.b32.xlu1 %v2109_v1, %s3090_s12 }
 0x84e   :  { %2184 = vrot.lane.b32.xlu0 %v2115_v47, %s3090_s12  ;;  %2199 = vrot.lane.b32.xlu1 %v2109_v1, %s3089_s27 }
 0x852   :  { %2201 = vrot.lane.b32.xlu0 %v2115_v47, %s3089_s27  ;;  %2216 = vrot.lane.b32.xlu1 %v2109_v1, %s3087_s17 }
 0x856   :  { %2218 = vrot.lane.b32.xlu0 %v2115_v47, %s3087_s17  ;;  %2233 = vrot.lane.b32.xlu1 %v2109_v1, %s3088_s18 }
 0x85a   :  { %2235 = vrot.lane.b32.xlu0 %v2115_v47, %s3088_s18  ;;  %2259 = vrot.lane.b32.xlu1 %v2111_v34, %s3093_s26 }
 0x85e   :  { %2261 = vrot.lane.b32.xlu0 %v2117_v17, %s3093_s26  ;;  %2276 = vrot.lane.b32.xlu1 %v2111_v34, %s3092_s23 }
 0x862   :  { %2278 = vrot.lane.b32.xlu0 %v2117_v17, %s3092_s23  ;;  %2293 = vrot.lane.b32.xlu1 %v2111_v34, %s3091_s19 }
 0x866   :  { %2295 = vrot.lane.b32.xlu0 %v2117_v17, %s3091_s19  ;;  %2310 = vrot.lane.b32.xlu1 %v2111_v34, %s3090_s12 }
 0x86a   :  { %2312 = vrot.lane.b32.xlu0 %v2117_v17, %s3090_s12  ;;  %2327 = vrot.lane.b32.xlu1 %v2111_v34, %s3089_s27 }
 0x86e   :  { %2329 = vrot.lane.b32.xlu0 %v2117_v17, %s3089_s27  ;;  %2344 = vrot.lane.b32.xlu1 %v2111_v34, %s3087_s17 }
 0x872   :  { %2346 = vrot.lane.b32.xlu0 %v2117_v17, %s3087_s17  ;;  %2361 = vrot.lane.b32.xlu1 %v2111_v34, %s3088_s18 }
 0x876   :  { %2363 = vrot.lane.b32.xlu0 %v2117_v17, %s3088_s18 }
 0x878   :  { %v2128_v15 = vpop.permute.xlu1 %2127 }
 0x879   :  { %2554 = vst.msk [vmem:[%s4808_s10 + $0x20] sm:$0xff] %vm626_vm0, %v2128_v15 }
 0x87c   :  { %v2130_v22 = vpop.permute.xlu0 %2129  ;;  %v2145_v40 = vpop.permute.xlu1 %2144 }
 0x87d   :  { %2555 = vst.msk [vmem:[%s4808_s10 + $0x28] sm:$0xff] %vm626_vm0, %v2130_v22  ;;  %2558 = vst.msk [vmem:[%s4808_s10 + $0x40] sm:$0xff] %vm626_vm0, %v2145_v40 }
 0x880   :  { %v2147_v57 = vpop.permute.xlu0 %2146  ;;  %v2162_v20 = vpop.permute.xlu1 %2161 }
 0x881   :  { %2559 = vst.msk [vmem:[%s4808_s10 + $0x48] sm:$0xff] %vm626_vm0, %v2147_v57  ;;  %2562 = vst.msk [vmem:[%s4808_s10 + $0x60] sm:$0xff] %vm626_vm0, %v2162_v20 }
 0x884   :  { %v2164_v6 = vpop.permute.xlu0 %2163  ;;  %v2179_v29 = vpop.permute.xlu1 %2178 }
 0x885   :  { %2563 = vst.msk [vmem:[%s4808_s10 + $0x68] sm:$0xff] %vm626_vm0, %v2164_v6  ;;  %2566 = vst.msk [vmem:[%s4808_s10 + $0x80] sm:$0xff] %vm626_vm0, %v2179_v29 }
 0x888   :  { %v2181_v33 = vpop.permute.xlu0 %2180  ;;  %v2196_v28 = vpop.permute.xlu1 %2195 }
 0x889   :  { %2567 = vst.msk [vmem:[%s4808_s10 + $0x88] sm:$0xff] %vm626_vm0, %v2181_v33  ;;  %2570 = vst.msk [vmem:[%s4808_s10 + $0xa0] sm:$0xff] %vm626_vm0, %v2196_v28 }
 0x88c   :  { %v2198_v26 = vpop.permute.xlu0 %2197  ;;  %v2213_v58 = vpop.permute.xlu1 %2212 }
 0x88d   :  { %2571 = vst.msk [vmem:[%s4808_s10 + $0xa8] sm:$0xff] %vm626_vm0, %v2198_v26  ;;  %2574 = vst.msk [vmem:[%s4808_s10 + $0xc0] sm:$0xff] %vm626_vm0, %v2213_v58 }
 0x890   :  { %v2215_v30 = vpop.permute.xlu0 %2214  ;;  %v2230_v38 = vpop.permute.xlu1 %2229 }
 0x891   :  { %2575 = vst.msk [vmem:[%s4808_s10 + $0xc8] sm:$0xff] %vm626_vm0, %v2215_v30  ;;  %2578 = vst.msk [vmem:[%s4808_s10 + $0xe0] sm:$0xff] %vm626_vm0, %v2230_v38 }
 0x894   :  { %v2232_v52 = vpop.permute.xlu0 %2231  ;;  %v2256_v39 = vpop.permute.xlu1 %2255 }
 0x895   :  { %2579 = vst.msk [vmem:[%s4808_s10 + $0xe8] sm:$0xff] %vm626_vm0, %v2232_v52  ;;  %2586 = vst.msk [vmem:[%s4808_s10 + $0x120] sm:$0xff] %vm626_vm0, %v2256_v39 }
 0x898   :  { %v2258_v61 = vpop.permute.xlu0 %2257  ;;  %v2273_v16 = vpop.permute.xlu1 %2272 }
 0x899   :  { %2587 = vst.msk [vmem:[%s4808_s10 + $0x128] sm:$0xff] %vm626_vm0, %v2258_v61  ;;  %2590 = vst.msk [vmem:[%s4808_s10 + $0x140] sm:$0xff] %vm626_vm0, %v2273_v16 }
 0x89c   :  { %v2275_v36 = vpop.permute.xlu0 %2274  ;;  %v2290_v53 = vpop.permute.xlu1 %2289 }
 0x89d   :  { %2591 = vst.msk [vmem:[%s4808_s10 + $0x148] sm:$0xff] %vm626_vm0, %v2275_v36  ;;  %2594 = vst.msk [vmem:[%s4808_s10 + $0x160] sm:$0xff] %vm626_vm0, %v2290_v53 }
 0x8a0   :  { %v2292_v13 = vpop.permute.xlu0 %2291  ;;  %v2307_v2 = vpop.permute.xlu1 %2306 }
 0x8a1   :  { %2595 = vst.msk [vmem:[%s4808_s10 + $0x168] sm:$0xff] %vm626_vm0, %v2292_v13  ;;  %2598 = vst.msk [vmem:[%s4808_s10 + $0x180] sm:$0xff] %vm626_vm0, %v2307_v2 }
 0x8a4   :  { %v2309_v41 = vpop.permute.xlu0 %2308  ;;  %v2324_v5 = vpop.permute.xlu1 %2323 }
 0x8a5   :  { %2599 = vst.msk [vmem:[%s4808_s10 + $0x188] sm:$0xff] %vm626_vm0, %v2309_v41  ;;  %2602 = vst.msk [vmem:[%s4808_s10 + $0x1a0] sm:$0xff] %vm626_vm0, %v2324_v5 }
 0x8a8   :  { %v2326_v11 = vpop.permute.xlu0 %2325  ;;  %v2341_v62 = vpop.permute.xlu1 %2340 }
 0x8a9   :  { %2603 = vst.msk [vmem:[%s4808_s10 + $0x1a8] sm:$0xff] %vm626_vm0, %v2326_v11  ;;  %2606 = vst.msk [vmem:[%s4808_s10 + $0x1c0] sm:$0xff] %vm626_vm0, %v2341_v62 }
 0x8ac   :  { %v2343_v7 = vpop.permute.xlu0 %2342  ;;  %v2358_v8 = vpop.permute.xlu1 %2357 }
 0x8ad   :  { %2607 = vst.msk [vmem:[%s4808_s10 + $0x1c8] sm:$0xff] %vm626_vm0, %v2343_v7  ;;  %2610 = vst.msk [vmem:[%s4808_s10 + $0x1e0] sm:$0xff] %vm626_vm0, %v2358_v8 }
 0x8b0   :  { %v2360_v51 = vpop.permute.xlu0 %2359  ;;  %v2132_v45 = vpop.permute.xlu1 %2131 }
 0x8b1   :  { %2611 = vst.msk [vmem:[%s4808_s10 + $0x1e8] sm:$0xff] %vm626_vm0, %v2360_v51  ;;  %2556 = vst.msk [vmem:[%s4808_s10 + $0x30] sm:$0xff] %vm626_vm0, %v2132_v45 }
 0x8b4   :  { %v2134_v25 = vpop.permute.xlu0 %2133  ;;  %v2149_v44 = vpop.permute.xlu1 %2148 }
 0x8b5   :  { %2557 = vst.msk [vmem:[%s4808_s10 + $0x38] sm:$0xff] %vm626_vm0, %v2134_v25  ;;  %2560 = vst.msk [vmem:[%s4808_s10 + $0x50] sm:$0xff] %vm626_vm0, %v2149_v44 }
 0x8b8   :  { %v2151_v46 = vpop.permute.xlu0 %2150  ;;  %v2166_v12 = vpop.permute.xlu1 %2165 }
 0x8b9   :  { %2561 = vst.msk [vmem:[%s4808_s10 + $0x58] sm:$0xff] %vm626_vm0, %v2151_v46  ;;  %2564 = vst.msk [vmem:[%s4808_s10 + $0x70] sm:$0xff] %vm626_vm0, %v2166_v12 }
 0x8bc   :  { %v2168_v14 = vpop.permute.xlu0 %2167  ;;  %v2183_v19 = vpop.permute.xlu1 %2182 }
 0x8bd   :  { %2565 = vst.msk [vmem:[%s4808_s10 + $0x78] sm:$0xff] %vm626_vm0, %v2168_v14  ;;  %2568 = vst.msk [vmem:[%s4808_s10 + $0x90] sm:$0xff] %vm626_vm0, %v2183_v19 }
 0x8c0   :  { %v2185_v42 = vpop.permute.xlu0 %2184  ;;  %v2200_v21 = vpop.permute.xlu1 %2199 }
 0x8c1   :  { %2569 = vst.msk [vmem:[%s4808_s10 + $0x98] sm:$0xff] %vm626_vm0, %v2185_v42  ;;  %2572 = vst.msk [vmem:[%s4808_s10 + $0xb0] sm:$0xff] %vm626_vm0, %v2200_v21 }
 0x8c4   :  { %v2202_v23 = vpop.permute.xlu0 %2201  ;;  %v2217_v48 = vpop.permute.xlu1 %2216 }
 0x8c5   :  { %2573 = vst.msk [vmem:[%s4808_s10 + $0xb8] sm:$0xff] %vm626_vm0, %v2202_v23  ;;  %2576 = vst.msk [vmem:[%s4808_s10 + $0xd0] sm:$0xff] %vm626_vm0, %v2217_v48 }
 0x8c8   :  { %v2219_v54 = vpop.permute.xlu0 %2218  ;;  %v2234_v27 = vpop.permute.xlu1 %2233 }
 0x8c9   :  { %2577 = vst.msk [vmem:[%s4808_s10 + $0xd8] sm:$0xff] %vm626_vm0, %v2219_v54  ;;  %2580 = vst.msk [vmem:[%s4808_s10 + $0xf0] sm:$0xff] %vm626_vm0, %v2234_v27 }
 0x8cc   :  { %v2236_v37 = vpop.permute.xlu0 %2235  ;;  %v2260_v49 = vpop.permute.xlu1 %2259 }
 0x8cd   :  { %2581 = vst.msk [vmem:[%s4808_s10 + $0xf8] sm:$0xff] %vm626_vm0, %v2236_v37  ;;  %2588 = vst.msk [vmem:[%s4808_s10 + $0x130] sm:$0xff] %vm626_vm0, %v2260_v49 }
 0x8d0   :  { %v2262_v31 = vpop.permute.xlu0 %2261  ;;  %v2277_v9 = vpop.permute.xlu1 %2276 }
 0x8d1   :  { %2589 = vst.msk [vmem:[%s4808_s10 + $0x138] sm:$0xff] %vm626_vm0, %v2262_v31  ;;  %2592 = vst.msk [vmem:[%s4808_s10 + $0x150] sm:$0xff] %vm626_vm0, %v2277_v9 }
 0x8d4   :  { %v2279_v35 = vpop.permute.xlu0 %2278  ;;  %v2294_v32 = vpop.permute.xlu1 %2293 }
 0x8d5   :  { %2593 = vst.msk [vmem:[%s4808_s10 + $0x158] sm:$0xff] %vm626_vm0, %v2279_v35  ;;  %2596 = vst.msk [vmem:[%s4808_s10 + $0x170] sm:$0xff] %vm626_vm0, %v2294_v32 }
 0x8d8   :  { %v2296_v56 = vpop.permute.xlu0 %2295  ;;  %v2311_v43 = vpop.permute.xlu1 %2310 }
 0x8d9   :  { %2597 = vst.msk [vmem:[%s4808_s10 + $0x178] sm:$0xff] %vm626_vm0, %v2296_v56  ;;  %2600 = vst.msk [vmem:[%s4808_s10 + $0x190] sm:$0xff] %vm626_vm0, %v2311_v43 }
 0x8dc   :  { %v2313_v3 = vpop.permute.xlu0 %2312  ;;  %v2328_v50 = vpop.permute.xlu1 %2327 }
 0x8dd   :  { %2601 = vst.msk [vmem:[%s4808_s10 + $0x198] sm:$0xff] %vm626_vm0, %v2313_v3  ;;  %2604 = vst.msk [vmem:[%s4808_s10 + $0x1b0] sm:$0xff] %vm626_vm0, %v2328_v50 }
 0x8e0   :  { %v2330_v59 = vpop.permute.xlu0 %2329  ;;  %v2345_v55 = vpop.permute.xlu1 %2344 }
 0x8e1   :  { %2605 = vst.msk [vmem:[%s4808_s10 + $0x1b8] sm:$0xff] %vm626_vm0, %v2330_v59  ;;  %2608 = vst.msk [vmem:[%s4808_s10 + $0x1d0] sm:$0xff] %vm626_vm0, %v2345_v55 }
 0x8e4   :  { %v2347_v60 = vpop.permute.xlu0 %2346  ;;  %v2362_v63 = vpop.permute.xlu1 %2361 }
 0x8e5   :  { %2609 = vst.msk [vmem:[%s4808_s10 + $0x1d8] sm:$0xff] %vm626_vm0, %v2347_v60  ;;  %2612 = vst.msk [vmem:[%s4808_s10 + $0x1f0] sm:$0xff] %vm626_vm0, %v2362_v63 }
 0x8e8   :  { %v2364_v4 = vpop.permute.xlu0 %2363 }
 0x8e9   :  { %2613 = vst.msk [vmem:[%s4808_s10 + $0x1f8] sm:$0xff] %vm626_vm0, %v2364_v4 }

</bundles_post_ra>
